<compile_context>
chip_gen: v7x
topology: tpu7x:2x2x1
jax: 0.10.0
libtpu: 0.0.40
codegen_flags: <defaults>
</compile_context>

<pallas_src>
import math

import jax
import jax.numpy as jnp
from jax.experimental import pallas as pl
from jax.experimental.pallas import tpu as pltpu

# ---- model hyper-parameters (ckpt_args / encoder_args) ----------------------
B = 2          # batch
S = 8          # sequence length
F = 6          # input_dim
D = 32         # d_model ("dmod")
NHEAD = 2
HEAD_DIM = D // NHEAD
DHID = 128     # d_hid
NLAYERS = 2
M_IND = 8      # number of inducing points ("ind")
LN_EPS = 1e-5

N_ROWS = B * S          # flattened (batch*seq) rows
G = NHEAD * B           # flattened (head*batch) attention groups

# GP / likelihood constants (deterministic synthetic "checkpoint" values)
LS_MATERN = 1.3
LS_RBF = 0.9
OUTPUTSCALE = 0.7
CONST_MEAN = 0.1
Y_MEAN = 0.05
Y_STD = 2.0
SQRT5 = math.sqrt(5.0)
OUT_BIAS = CONST_MEAN * Y_STD + Y_MEAN    # folded constant-mean + un-normalize bias

# -----------------------------------------------------------------------------
# Packed parameter slab: static layout computed at trace/compile time.
# Every parameter lives at a sublane-tile-aligned row offset (multiple of 8),
# lanes [0:ncols] of a (SLAB_ROWS, 128) f32 slab.
# -----------------------------------------------------------------------------
SLAB_COLS = 128


def _pad8(n):
    return ((n + 7) // 8) * 8


def _param_specs():
    specs = [('wproj', (F, D)), ('bproj', (1, D))]
    for l in range(NLAYERS):
        specs += [
            (f'wqkv{l}', (D, 3 * D)), (f'bqkv{l}', (1, 3 * D)),
            (f'wo{l}',   (D, D)),     (f'bo{l}',   (1, D)),
            (f'ln1g{l}', (1, D)),     (f'ln1b{l}', (1, D)),
            (f'w1{l}',   (D, DHID)),  (f'b1{l}',   (1, DHID)),
            (f'w2{l}',   (DHID, D)),  (f'b2{l}',   (1, D)),
            (f'ln2g{l}', (1, D)),     (f'ln2b{l}', (1, D)),
        ]
    specs += [
        ('woutp', (D, D)), ('boutp', (1, D)),
        ('fng', (1, D)), ('fnb', (1, D)),
        ('zindT', (D, M_IND)), ('zisq', (1, M_IND)), ('alpha', (1, M_IND)),
    ]
    return specs


_PARAM_SPECS = _param_specs()
_LAYOUT = {}
_row = 0
for _name, (_r, _c) in _PARAM_SPECS:
    _LAYOUT[_name] = (_row, _r, _c)
    _row += _pad8(_r)
SLAB_ROWS = _row   # = 696 rows -> ~348 KiB f32


def _p(slab_ref, name):
    """Static-offset slice of one parameter out of the packed slab."""
    off, r, c = _LAYOUT[name]
    return slab_ref[off:off + r, 0:c]


def _layer_norm(x, g, b):
    # sum(x) and sum(x*x) issued back-to-back so the two lane reductions
    # overlap on the XLU; var = E[x^2] - E[x]^2 (clamped).
    inv_n = 1.0 / x.shape[-1]
    s1 = jnp.sum(x, axis=-1, keepdims=True)
    s2 = jnp.sum(x * x, axis=-1, keepdims=True)
    mu = s1 * inv_n
    var = jnp.maximum(s2 * inv_n - mu * mu, 0.0)
    return (x - mu) * jax.lax.rsqrt(var + LN_EPS) * g + b


# -----------------------------------------------------------------------------
# Fused kernel: Linear proj -> 2x TransformerEncoderLayer (post-LN, 2-head
# attention, ReLU FFN, eval-mode dropout=identity) -> mean-pool -> Linear ->
# LayerNorm -> SVGP predictive mean (ScaleKernel(Matern2.5 + RBF), whitened
# variational mean folded into alpha) -> un-normalize.     (B*S,F) -> (B,1)
# -----------------------------------------------------------------------------
def fused_kernel(x_ref, slab_ref, o_ref):
    # ---- input projection: one flat (N,F)@(F,D) MXU pass ---------------------
    h = jnp.dot(x_ref[...], _p(slab_ref, 'wproj'),
                preferred_element_type=jnp.float32) + _p(slab_ref, 'bproj')   # (N,D)

    for l in range(NLAYERS):
        # ---- multi-head self-attention: one stacked QKV matmul ---------------
        # (1/sqrt(HEAD_DIM) is pre-folded into the Q columns of wqkv/bqkv)
        qkv = jnp.dot(h, _p(slab_ref, f'wqkv{l}'),
                      preferred_element_type=jnp.float32) + _p(slab_ref, f'bqkv{l}')

        def _split_heads(base):
            # (N, D) lane block -> (G, S, HEAD_DIM), group = head*B + b
            parts = [
                qkv[:, base + hh * HEAD_DIM: base + (hh + 1) * HEAD_DIM
                    ].reshape(B, S, HEAD_DIM)
                for hh in range(NHEAD)
            ]
            return jnp.concatenate(parts, axis=0)

        qg = _split_heads(0)
        kg = _split_heads(D)
        vg = _split_heads(2 * D)

        s = jnp.einsum('gqd,gkd->gqk', qg, kg,
                       preferred_element_type=jnp.float32)               # (G,S,S)
        s = s - jnp.max(s, axis=-1, keepdims=True)
        pr = jnp.exp(s)
        pr = pr * pl.reciprocal(jnp.sum(pr, axis=-1, keepdims=True), approx=True)
        ctx = jnp.einsum('gqk,gkd->gqd', pr, vg,
                         preferred_element_type=jnp.float32)             # (G,S,Hd)

        # heads back to lanes (PyTorch concat order) -> single (N,D)@(D,D) matmul
        ctx2 = jnp.concatenate(
            [ctx[hh * B:(hh + 1) * B].reshape(N_ROWS, HEAD_DIM)
             for hh in range(NHEAD)],
            axis=-1)                                                     # (N,D)
        attn = jnp.dot(ctx2, _p(slab_ref, f'wo{l}'),
                       preferred_element_type=jnp.float32) + _p(slab_ref, f'bo{l}')
        h = _layer_norm(h + attn, _p(slab_ref, f'ln1g{l}'), _p(slab_ref, f'ln1b{l}'))

        # ---- feed-forward (ReLU), flat 2-D matmuls ----------------------------
        ff = jnp.dot(h, _p(slab_ref, f'w1{l}'),
                     preferred_element_type=jnp.float32) + _p(slab_ref, f'b1{l}')
        ff = jnp.maximum(ff, 0.0)
        ff = jnp.dot(ff, _p(slab_ref, f'w2{l}'),
                     preferred_element_type=jnp.float32) + _p(slab_ref, f'b2{l}')
        h = _layer_norm(h + ff, _p(slab_ref, f'ln2g{l}'), _p(slab_ref, f'ln2b{l}'))

    # ---- mean-pool over sequence, output projection, final LayerNorm ---------
    pooled = jnp.mean(h.reshape(B, S, D), axis=1)                        # (B,D)
    out = jnp.dot(pooled, _p(slab_ref, 'woutp'),
                  preferred_element_type=jnp.float32) + _p(slab_ref, 'boutp')
    z = _layer_norm(out, _p(slab_ref, 'fng'), _p(slab_ref, 'fnb'))       # (B,D)

    # ---- SVGP predictive mean (z never leaves VMEM) ---------------------------
    zz = jnp.sum(z * z, axis=-1, keepdims=True)                          # (B,1)
    cross = jnp.dot(z, _p(slab_ref, 'zindT'),
                    preferred_element_type=jnp.float32)                  # (B,M)
    sq = jnp.maximum(zz + _p(slab_ref, 'zisq') - 2.0 * cross, 0.0)       # (B,M)

    # Matern nu=2.5 + RBF (outputscale folded into alpha)
    d_m = jnp.sqrt(sq) * (1.0 / LS_MATERN)
    k_m = (1.0 + SQRT5 * d_m + (5.0 / 3.0) * d_m * d_m) * jnp.exp(-SQRT5 * d_m)
    k_r = jnp.exp(-0.5 * sq * (1.0 / (LS_RBF * LS_RBF)))

    # final (B,1) = lane reduce on the VPU/XLU (alpha carries OUTPUTSCALE*Y_STD);
    # avoids an epilogue (2,8)@(8,1) MXU push/drain on the serial tail.
    pred = jnp.sum((k_m + k_r) * _p(slab_ref, 'alpha'), axis=-1, keepdims=True)
    o_ref[...] = pred + OUT_BIAS                                          # (B,1)


# -----------------------------------------------------------------------------
# Plain-JAX glue: parameter setup (x-independent) + slab packing
# -----------------------------------------------------------------------------
def _cov(x1, x2):
    diff = x1[:, None, :] - x2[None, :, :]
    sq = jnp.maximum(jnp.sum(diff * diff, axis=-1), 0.0)
    d_m = jnp.sqrt(sq) / LS_MATERN
    k_m = (1.0 + SQRT5 * d_m + (5.0 / 3.0) * d_m * d_m) * jnp.exp(-SQRT5 * d_m)
    k_r = jnp.exp(-0.5 * sq / (LS_RBF * LS_RBF))
    return OUTPUTSCALE * (k_m + k_r)


def _pack(params):
    blocks = []
    for name, (r, c) in _PARAM_SPECS:
        arr = params[name].astype(jnp.float32)
        assert arr.shape == (r, c), (name, arr.shape, (r, c))
        blk = jnp.zeros((_pad8(r), SLAB_COLS), jnp.float32)
        blocks.append(blk.at[:r, :c].set(arr))
    return jnp.concatenate(blocks, axis=0)          # (SLAB_ROWS, 128)


def make_params(key):
    ks = list(jax.random.split(key, 16))
    n = lambda k, shape, s=0.05: (jax.random.normal(k, shape) * s).astype(jnp.float32)
    qscale = 1.0 / math.sqrt(HEAD_DIM)

    p = {}
    p['wproj'] = n(ks[0], (F, D))
    p['bproj'] = n(ks[1], (1, D))

    # stacked QKV weights, column order [q | k | v], heads contiguous inside
    # each block; attention scale folded into the q columns.
    wqkv = n(ks[2], (NLAYERS, D, 3 * D))
    bqkv = n(ks[3], (NLAYERS, 1, 3 * D))
    wqkv = wqkv.at[:, :, :D].multiply(qscale)
    bqkv = bqkv.at[:, :, :D].multiply(qscale)
    wo = n(ks[4], (NLAYERS, D, D))
    bo = n(ks[5], (NLAYERS, 1, D))
    w1 = n(ks[6], (NLAYERS, D, DHID))
    b1 = n(ks[7], (NLAYERS, 1, DHID))
    w2 = n(ks[8], (NLAYERS, DHID, D))
    b2 = n(ks[9], (NLAYERS, 1, D))
    for l in range(NLAYERS):
        p[f'wqkv{l}'] = wqkv[l]
        p[f'bqkv{l}'] = bqkv[l]
        p[f'wo{l}'] = wo[l]
        p[f'bo{l}'] = bo[l]
        p[f'ln1g{l}'] = jnp.ones((1, D), jnp.float32)
        p[f'ln1b{l}'] = jnp.zeros((1, D), jnp.float32)
        p[f'w1{l}'] = w1[l]
        p[f'b1{l}'] = b1[l]
        p[f'w2{l}'] = w2[l]
        p[f'b2{l}'] = b2[l]
        p[f'ln2g{l}'] = jnp.ones((1, D), jnp.float32)
        p[f'ln2b{l}'] = jnp.zeros((1, D), jnp.float32)

    p['woutp'] = n(ks[10], (D, D))
    p['boutp'] = n(ks[11], (1, D))
    p['fng'] = jnp.ones((1, D), jnp.float32)
    p['fnb'] = jnp.zeros((1, D), jnp.float32)

    # SVGP: inducing points Z, whitened variational mean m.
    Z = jax.random.normal(ks[12], (M_IND, D)).astype(jnp.float32)
    m_var = (jax.random.normal(ks[13], (M_IND, 1)) * 0.3).astype(jnp.float32)
    # TODO(synk): Cholesky / triangular solve of the (M,M) K_zz stays in plain
    # JAX (x-independent parameter folding; no Pallas cholesky primitive).
    Kzz = _cov(Z, Z) + 1e-4 * jnp.eye(M_IND, dtype=jnp.float32)
    L = jnp.linalg.cholesky(Kzz)
    alpha = jax.scipy.linalg.solve_triangular(L, m_var, lower=True, trans='T')  # (M,1)
    p['zindT'] = Z.T.astype(jnp.float32)                                  # (D,M)
    p['zisq'] = jnp.sum(Z * Z, axis=-1)[None, :].astype(jnp.float32)      # (1,M)
    # fold kernel outputscale and y_std into alpha; row layout for VPU reduce.
    p['alpha'] = (alpha.T * (OUTPUTSCALE * Y_STD)).astype(jnp.float32)    # (1,M)

    return _pack(p)


# -----------------------------------------------------------------------------
# Wrapper: one fused pallas_call, two entry DMAs (x + packed parameter slab)
# -----------------------------------------------------------------------------
_VMEM = pl.BlockSpec(memory_space=pltpu.MemorySpace.VMEM)


def residual_model_forward(x, slab):
    x2 = x.reshape(N_ROWS, F)   # flatten (B,S) -> rows outside the kernel (free)
    return pl.pallas_call(
        fused_kernel,
        out_shape=jax.ShapeDtypeStruct((B, 1), jnp.float32),
        in_specs=[_VMEM, _VMEM],
        out_specs=_VMEM,
    )(x2, slab)


if __name__ == "__main__":
    key = jax.random.PRNGKey(0)
    k_x, k_p = jax.random.split(key)
    x = jax.random.normal(k_x, (B, S, F), dtype=jnp.float32)
    slab = make_params(k_p)

    out = jax.jit(residual_model_forward)(x, slab)
    out = jax.block_until_ready(out)
    assert out.shape == (B, 1) and bool(jnp.all(jnp.isfinite(out)))
    print("KERNEL_OK")
</pallas_src>

<mosaic_0001>
module attributes {stable_mosaic.version = 11 : i64} {
  func.func @fused_kernel(%arg0: memref<16x6xf32, #tpu.memory_space<vmem>>, %arg1: memref<696x128xf32, #tpu.memory_space<vmem>>, %arg2: memref<2x1xf32, #tpu.memory_space<vmem>>) attributes {dimension_semantics = [], scalar_prefetch = 0 : i64, scratch_operands = 0 : i64, tpu.core_type = #tpu.core_type<tc>} {
    %c0 = arith.constant 0 : index
    %c0_0 = arith.constant 0 : index
    %0 = vector.load %arg0[%c0, %c0_0] : memref<16x6xf32, #tpu.memory_space<vmem>>, vector<16x6xf32>
    %c0_1 = arith.constant 0 : index
    %c0_2 = arith.constant 0 : index
    %1 = vector.load %arg1[%c0_1, %c0_2] : memref<696x128xf32, #tpu.memory_space<vmem>>, vector<6x32xf32>
    %cst = arith.constant dense<0.000000e+00> : vector<16x32xf32>
    %2 = tpu.matmul %0, %1, %cst {dimension_numbers = #tpu.dot_dimension_numbers<[1], [0], [0], [1], [0, 0, 1, 1], [], []>} : vector<16x6xf32>, vector<6x32xf32>, vector<16x32xf32> -> vector<16x32xf32>
    %c8 = arith.constant 8 : index
    %c0_3 = arith.constant 0 : index
    %3 = vector.load %arg1[%c8, %c0_3] : memref<696x128xf32, #tpu.memory_space<vmem>>, vector<1x32xf32>
    %4 = vector.broadcast %3 : vector<1x32xf32> to vector<16x32xf32>
    %5 = arith.addf %2, %4 : vector<16x32xf32>
    %c16 = arith.constant 16 : index
    %c0_4 = arith.constant 0 : index
    %6 = vector.load %arg1[%c16, %c0_4] : memref<696x128xf32, #tpu.memory_space<vmem>>, vector<32x96xf32>
    %cst_5 = arith.constant dense<0.000000e+00> : vector<16x96xf32>
    %7 = tpu.matmul %5, %6, %cst_5 {dimension_numbers = #tpu.dot_dimension_numbers<[1], [0], [0], [1], [0, 0, 1, 1], [], []>} : vector<16x32xf32>, vector<32x96xf32>, vector<16x96xf32> -> vector<16x96xf32>
    %c48 = arith.constant 48 : index
    %c0_6 = arith.constant 0 : index
    %8 = vector.load %arg1[%c48, %c0_6] : memref<696x128xf32, #tpu.memory_space<vmem>>, vector<1x96xf32>
    %9 = vector.broadcast %8 : vector<1x96xf32> to vector<16x96xf32>
    %10 = arith.addf %7, %9 : vector<16x96xf32>
    %11 = vector.extract_strided_slice %10 {offsets = [0, 0], sizes = [16, 16], strides = [1, 1]} : vector<16x96xf32> to vector<16x16xf32>
    %12 = vector.shape_cast %11 : vector<16x16xf32> to vector<2x8x16xf32>
    %13 = vector.extract_strided_slice %10 {offsets = [0, 16], sizes = [16, 16], strides = [1, 1]} : vector<16x96xf32> to vector<16x16xf32>
    %14 = vector.shape_cast %13 : vector<16x16xf32> to vector<2x8x16xf32>
    %15 = tpu.concatenate %12, %14 in 0 : vector<2x8x16xf32>, vector<2x8x16xf32> -> vector<4x8x16xf32>
    %16 = vector.extract_strided_slice %10 {offsets = [0, 32], sizes = [16, 16], strides = [1, 1]} : vector<16x96xf32> to vector<16x16xf32>
    %17 = vector.shape_cast %16 : vector<16x16xf32> to vector<2x8x16xf32>
    %18 = vector.extract_strided_slice %10 {offsets = [0, 48], sizes = [16, 16], strides = [1, 1]} : vector<16x96xf32> to vector<16x16xf32>
    %19 = vector.shape_cast %18 : vector<16x16xf32> to vector<2x8x16xf32>
    %20 = tpu.concatenate %17, %19 in 0 : vector<2x8x16xf32>, vector<2x8x16xf32> -> vector<4x8x16xf32>
    %21 = vector.extract_strided_slice %10 {offsets = [0, 64], sizes = [16, 16], strides = [1, 1]} : vector<16x96xf32> to vector<16x16xf32>
    %22 = vector.shape_cast %21 : vector<16x16xf32> to vector<2x8x16xf32>
    %23 = vector.extract_strided_slice %10 {offsets = [0, 80], sizes = [16, 16], strides = [1, 1]} : vector<16x96xf32> to vector<16x16xf32>
    %24 = vector.shape_cast %23 : vector<16x16xf32> to vector<2x8x16xf32>
    %25 = tpu.concatenate %22, %24 in 0 : vector<2x8x16xf32>, vector<2x8x16xf32> -> vector<4x8x16xf32>
    "tpu.trace_start"() <{level = 10 : i32, message = "gqd,gkd->gqk"}> : () -> ()
    %cst_7 = arith.constant dense<0.000000e+00> : vector<4x8x8xf32>
    %26 = tpu.matmul %15, %20, %cst_7 {dimension_numbers = #tpu.dot_dimension_numbers<[2], [2], [1], [1], [0, 0, 0, 1, 1, 1], [0], [0]>} : vector<4x8x16xf32>, vector<4x8x16xf32>, vector<4x8x8xf32> -> vector<4x8x8xf32>
    "tpu.trace_stop"() : () -> ()
    %cst_8 = arith.constant dense<0xFF800000> : vector<4x8xf32>
    %27 = vector.multi_reduction <maximumf>, %26, %cst_8 [2] : vector<4x8x8xf32> to vector<4x8xf32>
    %28 = vector.shape_cast %27 : vector<4x8xf32> to vector<4x8x1xf32>
    %29 = vector.broadcast %28 : vector<4x8x1xf32> to vector<4x8x8xf32>
    %30 = arith.subf %26, %29 : vector<4x8x8xf32>
    %31 = math.exp %30 : vector<4x8x8xf32>
    %cst_9 = arith.constant dense<0.000000e+00> : vector<4x8xf32>
    %32 = vector.multi_reduction <add>, %31, %cst_9 [2] : vector<4x8x8xf32> to vector<4x8xf32>
    %33 = vector.shape_cast %32 : vector<4x8xf32> to vector<4x8x1xf32>
    %34 = tpu.reciprocal %33 {approx = true} : vector<4x8x1xf32> -> vector<4x8x1xf32>
    %35 = vector.broadcast %34 : vector<4x8x1xf32> to vector<4x8x8xf32>
    %36 = arith.mulf %31, %35 : vector<4x8x8xf32>
    "tpu.trace_start"() <{level = 10 : i32, message = "gqk,gkd->gqd"}> : () -> ()
    %cst_10 = arith.constant dense<0.000000e+00> : vector<4x8x16xf32>
    %37 = tpu.matmul %36, %25, %cst_10 {dimension_numbers = #tpu.dot_dimension_numbers<[2], [1], [1], [2], [0, 0, 0, 1, 1, 2], [0], [0]>} : vector<4x8x8xf32>, vector<4x8x16xf32>, vector<4x8x16xf32> -> vector<4x8x16xf32>
    "tpu.trace_stop"() : () -> ()
    %38 = vector.extract_strided_slice %37 {offsets = [0, 0, 0], sizes = [2, 8, 16], strides = [1, 1, 1]} : vector<4x8x16xf32> to vector<2x8x16xf32>
    %39 = vector.shape_cast %38 : vector<2x8x16xf32> to vector<16x16xf32>
    %40 = vector.extract_strided_slice %37 {offsets = [2, 0, 0], sizes = [2, 8, 16], strides = [1, 1, 1]} : vector<4x8x16xf32> to vector<2x8x16xf32>
    %41 = vector.shape_cast %40 : vector<2x8x16xf32> to vector<16x16xf32>
    %42 = tpu.concatenate %39, %41 in 1 : vector<16x16xf32>, vector<16x16xf32> -> vector<16x32xf32>
    %c56 = arith.constant 56 : index
    %c0_11 = arith.constant 0 : index
    %43 = vector.load %arg1[%c56, %c0_11] : memref<696x128xf32, #tpu.memory_space<vmem>>, vector<32x32xf32>
    %cst_12 = arith.constant dense<0.000000e+00> : vector<16x32xf32>
    %44 = tpu.matmul %42, %43, %cst_12 {dimension_numbers = #tpu.dot_dimension_numbers<[1], [0], [0], [1], [0, 0, 1, 1], [], []>} : vector<16x32xf32>, vector<32x32xf32>, vector<16x32xf32> -> vector<16x32xf32>
    %c88 = arith.constant 88 : index
    %c0_13 = arith.constant 0 : index
    %45 = vector.load %arg1[%c88, %c0_13] : memref<696x128xf32, #tpu.memory_space<vmem>>, vector<1x32xf32>
    %46 = vector.broadcast %45 : vector<1x32xf32> to vector<16x32xf32>
    %47 = arith.addf %44, %46 : vector<16x32xf32>
    %48 = arith.addf %5, %47 : vector<16x32xf32>
    %c96 = arith.constant 96 : index
    %c0_14 = arith.constant 0 : index
    %49 = vector.load %arg1[%c96, %c0_14] : memref<696x128xf32, #tpu.memory_space<vmem>>, vector<1x32xf32>
    %c104 = arith.constant 104 : index
    %c0_15 = arith.constant 0 : index
    %50 = vector.load %arg1[%c104, %c0_15] : memref<696x128xf32, #tpu.memory_space<vmem>>, vector<1x32xf32>
    %cst_16 = arith.constant dense<0.000000e+00> : vector<16xf32>
    %51 = vector.multi_reduction <add>, %48, %cst_16 [1] : vector<16x32xf32> to vector<16xf32>
    %52 = vector.shape_cast %51 : vector<16xf32> to vector<16x1xf32>
    %53 = arith.mulf %48, %48 : vector<16x32xf32>
    %cst_17 = arith.constant dense<0.000000e+00> : vector<16xf32>
    %54 = vector.multi_reduction <add>, %53, %cst_17 [1] : vector<16x32xf32> to vector<16xf32>
    %55 = vector.shape_cast %54 : vector<16xf32> to vector<16x1xf32>
    %cst_18 = arith.constant 3.125000e-02 : f32
    %56 = vector.broadcast %cst_18 : f32 to vector<16x1xf32>
    %57 = arith.mulf %52, %56 : vector<16x1xf32>
    %cst_19 = arith.constant 3.125000e-02 : f32
    %58 = vector.broadcast %cst_19 : f32 to vector<16x1xf32>
    %59 = arith.mulf %55, %58 : vector<16x1xf32>
    %60 = arith.mulf %57, %57 : vector<16x1xf32>
    %61 = arith.subf %59, %60 : vector<16x1xf32>
    %cst_20 = arith.constant 0.000000e+00 : f32
    %62 = vector.broadcast %cst_20 : f32 to vector<16x1xf32>
    %63 = arith.maximumf %61, %62 : vector<16x1xf32>
    %64 = vector.broadcast %57 : vector<16x1xf32> to vector<16x32xf32>
    %65 = arith.subf %48, %64 : vector<16x32xf32>
    %cst_21 = arith.constant 9.99999974E-6 : f32
    %66 = vector.broadcast %cst_21 : f32 to vector<16x1xf32>
    %67 = arith.addf %63, %66 : vector<16x1xf32>
    %68 = math.rsqrt %67 : vector<16x1xf32>
    %69 = vector.broadcast %68 : vector<16x1xf32> to vector<16x32xf32>
    %70 = arith.mulf %65, %69 : vector<16x32xf32>
    %71 = vector.broadcast %49 : vector<1x32xf32> to vector<16x32xf32>
    %72 = arith.mulf %70, %71 : vector<16x32xf32>
    %73 = vector.broadcast %50 : vector<1x32xf32> to vector<16x32xf32>
    %74 = arith.addf %72, %73 : vector<16x32xf32>
    %c112 = arith.constant 112 : index
    %c0_22 = arith.constant 0 : index
    %75 = vector.load %arg1[%c112, %c0_22] : memref<696x128xf32, #tpu.memory_space<vmem>>, vector<32x128xf32>
    %cst_23 = arith.constant dense<0.000000e+00> : vector<16x128xf32>
    %76 = tpu.matmul %74, %75, %cst_23 {dimension_numbers = #tpu.dot_dimension_numbers<[1], [0], [0], [1], [0, 0, 1, 1], [], []>} : vector<16x32xf32>, vector<32x128xf32>, vector<16x128xf32> -> vector<16x128xf32>
    %c144 = arith.constant 144 : index
    %c0_24 = arith.constant 0 : index
    %77 = vector.load %arg1[%c144, %c0_24] : memref<696x128xf32, #tpu.memory_space<vmem>>, vector<1x128xf32>
    %78 = vector.broadcast %77 : vector<1x128xf32> to vector<16x128xf32>
    %79 = arith.addf %76, %78 : vector<16x128xf32>
    %cst_25 = arith.constant 0.000000e+00 : f32
    %80 = vector.broadcast %cst_25 : f32 to vector<16x128xf32>
    %81 = arith.maximumf %79, %80 : vector<16x128xf32>
    %c152 = arith.constant 152 : index
    %c0_26 = arith.constant 0 : index
    %82 = vector.load %arg1[%c152, %c0_26] : memref<696x128xf32, #tpu.memory_space<vmem>>, vector<128x32xf32>
    %cst_27 = arith.constant dense<0.000000e+00> : vector<16x32xf32>
    %83 = tpu.matmul %81, %82, %cst_27 {dimension_numbers = #tpu.dot_dimension_numbers<[1], [0], [0], [1], [0, 0, 1, 1], [], []>} : vector<16x128xf32>, vector<128x32xf32>, vector<16x32xf32> -> vector<16x32xf32>
    %c280 = arith.constant 280 : index
    %c0_28 = arith.constant 0 : index
    %84 = vector.load %arg1[%c280, %c0_28] : memref<696x128xf32, #tpu.memory_space<vmem>>, vector<1x32xf32>
    %85 = vector.broadcast %84 : vector<1x32xf32> to vector<16x32xf32>
    %86 = arith.addf %83, %85 : vector<16x32xf32>
    %87 = arith.addf %74, %86 : vector<16x32xf32>
    %c288 = arith.constant 288 : index
    %c0_29 = arith.constant 0 : index
    %88 = vector.load %arg1[%c288, %c0_29] : memref<696x128xf32, #tpu.memory_space<vmem>>, vector<1x32xf32>
    %c296 = arith.constant 296 : index
    %c0_30 = arith.constant 0 : index
    %89 = vector.load %arg1[%c296, %c0_30] : memref<696x128xf32, #tpu.memory_space<vmem>>, vector<1x32xf32>
    %cst_31 = arith.constant dense<0.000000e+00> : vector<16xf32>
    %90 = vector.multi_reduction <add>, %87, %cst_31 [1] : vector<16x32xf32> to vector<16xf32>
    %91 = vector.shape_cast %90 : vector<16xf32> to vector<16x1xf32>
    %92 = arith.mulf %87, %87 : vector<16x32xf32>
    %cst_32 = arith.constant dense<0.000000e+00> : vector<16xf32>
    %93 = vector.multi_reduction <add>, %92, %cst_32 [1] : vector<16x32xf32> to vector<16xf32>
    %94 = vector.shape_cast %93 : vector<16xf32> to vector<16x1xf32>
    %cst_33 = arith.constant 3.125000e-02 : f32
    %95 = vector.broadcast %cst_33 : f32 to vector<16x1xf32>
    %96 = arith.mulf %91, %95 : vector<16x1xf32>
    %cst_34 = arith.constant 3.125000e-02 : f32
    %97 = vector.broadcast %cst_34 : f32 to vector<16x1xf32>
    %98 = arith.mulf %94, %97 : vector<16x1xf32>
    %99 = arith.mulf %96, %96 : vector<16x1xf32>
    %100 = arith.subf %98, %99 : vector<16x1xf32>
    %cst_35 = arith.constant 0.000000e+00 : f32
    %101 = vector.broadcast %cst_35 : f32 to vector<16x1xf32>
    %102 = arith.maximumf %100, %101 : vector<16x1xf32>
    %103 = vector.broadcast %96 : vector<16x1xf32> to vector<16x32xf32>
    %104 = arith.subf %87, %103 : vector<16x32xf32>
    %cst_36 = arith.constant 9.99999974E-6 : f32
    %105 = vector.broadcast %cst_36 : f32 to vector<16x1xf32>
    %106 = arith.addf %102, %105 : vector<16x1xf32>
    %107 = math.rsqrt %106 : vector<16x1xf32>
    %108 = vector.broadcast %107 : vector<16x1xf32> to vector<16x32xf32>
    %109 = arith.mulf %104, %108 : vector<16x32xf32>
    %110 = vector.broadcast %88 : vector<1x32xf32> to vector<16x32xf32>
    %111 = arith.mulf %109, %110 : vector<16x32xf32>
    %112 = vector.broadcast %89 : vector<1x32xf32> to vector<16x32xf32>
    %113 = arith.addf %111, %112 : vector<16x32xf32>
    %c304 = arith.constant 304 : index
    %c0_37 = arith.constant 0 : index
    %114 = vector.load %arg1[%c304, %c0_37] : memref<696x128xf32, #tpu.memory_space<vmem>>, vector<32x96xf32>
    %cst_38 = arith.constant dense<0.000000e+00> : vector<16x96xf32>
    %115 = tpu.matmul %113, %114, %cst_38 {dimension_numbers = #tpu.dot_dimension_numbers<[1], [0], [0], [1], [0, 0, 1, 1], [], []>} : vector<16x32xf32>, vector<32x96xf32>, vector<16x96xf32> -> vector<16x96xf32>
    %c336 = arith.constant 336 : index
    %c0_39 = arith.constant 0 : index
    %116 = vector.load %arg1[%c336, %c0_39] : memref<696x128xf32, #tpu.memory_space<vmem>>, vector<1x96xf32>
    %117 = vector.broadcast %116 : vector<1x96xf32> to vector<16x96xf32>
    %118 = arith.addf %115, %117 : vector<16x96xf32>
    %119 = vector.extract_strided_slice %118 {offsets = [0, 0], sizes = [16, 16], strides = [1, 1]} : vector<16x96xf32> to vector<16x16xf32>
    %120 = vector.shape_cast %119 : vector<16x16xf32> to vector<2x8x16xf32>
    %121 = vector.extract_strided_slice %118 {offsets = [0, 16], sizes = [16, 16], strides = [1, 1]} : vector<16x96xf32> to vector<16x16xf32>
    %122 = vector.shape_cast %121 : vector<16x16xf32> to vector<2x8x16xf32>
    %123 = tpu.concatenate %120, %122 in 0 : vector<2x8x16xf32>, vector<2x8x16xf32> -> vector<4x8x16xf32>
    %124 = vector.extract_strided_slice %118 {offsets = [0, 32], sizes = [16, 16], strides = [1, 1]} : vector<16x96xf32> to vector<16x16xf32>
    %125 = vector.shape_cast %124 : vector<16x16xf32> to vector<2x8x16xf32>
    %126 = vector.extract_strided_slice %118 {offsets = [0, 48], sizes = [16, 16], strides = [1, 1]} : vector<16x96xf32> to vector<16x16xf32>
    %127 = vector.shape_cast %126 : vector<16x16xf32> to vector<2x8x16xf32>
    %128 = tpu.concatenate %125, %127 in 0 : vector<2x8x16xf32>, vector<2x8x16xf32> -> vector<4x8x16xf32>
    %129 = vector.extract_strided_slice %118 {offsets = [0, 64], sizes = [16, 16], strides = [1, 1]} : vector<16x96xf32> to vector<16x16xf32>
    %130 = vector.shape_cast %129 : vector<16x16xf32> to vector<2x8x16xf32>
    %131 = vector.extract_strided_slice %118 {offsets = [0, 80], sizes = [16, 16], strides = [1, 1]} : vector<16x96xf32> to vector<16x16xf32>
    %132 = vector.shape_cast %131 : vector<16x16xf32> to vector<2x8x16xf32>
    %133 = tpu.concatenate %130, %132 in 0 : vector<2x8x16xf32>, vector<2x8x16xf32> -> vector<4x8x16xf32>
    "tpu.trace_start"() <{level = 10 : i32, message = "gqd,gkd->gqk"}> : () -> ()
    %cst_40 = arith.constant dense<0.000000e+00> : vector<4x8x8xf32>
    %134 = tpu.matmul %123, %128, %cst_40 {dimension_numbers = #tpu.dot_dimension_numbers<[2], [2], [1], [1], [0, 0, 0, 1, 1, 1], [0], [0]>} : vector<4x8x16xf32>, vector<4x8x16xf32>, vector<4x8x8xf32> -> vector<4x8x8xf32>
    "tpu.trace_stop"() : () -> ()
    %cst_41 = arith.constant dense<0xFF800000> : vector<4x8xf32>
    %135 = vector.multi_reduction <maximumf>, %134, %cst_41 [2] : vector<4x8x8xf32> to vector<4x8xf32>
    %136 = vector.shape_cast %135 : vector<4x8xf32> to vector<4x8x1xf32>
    %137 = vector.broadcast %136 : vector<4x8x1xf32> to vector<4x8x8xf32>
    %138 = arith.subf %134, %137 : vector<4x8x8xf32>
    %139 = math.exp %138 : vector<4x8x8xf32>
    %cst_42 = arith.constant dense<0.000000e+00> : vector<4x8xf32>
    %140 = vector.multi_reduction <add>, %139, %cst_42 [2] : vector<4x8x8xf32> to vector<4x8xf32>
    %141 = vector.shape_cast %140 : vector<4x8xf32> to vector<4x8x1xf32>
    %142 = tpu.reciprocal %141 {approx = true} : vector<4x8x1xf32> -> vector<4x8x1xf32>
    %143 = vector.broadcast %142 : vector<4x8x1xf32> to vector<4x8x8xf32>
    %144 = arith.mulf %139, %143 : vector<4x8x8xf32>
    "tpu.trace_start"() <{level = 10 : i32, message = "gqk,gkd->gqd"}> : () -> ()
    %cst_43 = arith.constant dense<0.000000e+00> : vector<4x8x16xf32>
    %145 = tpu.matmul %144, %133, %cst_43 {dimension_numbers = #tpu.dot_dimension_numbers<[2], [1], [1], [2], [0, 0, 0, 1, 1, 2], [0], [0]>} : vector<4x8x8xf32>, vector<4x8x16xf32>, vector<4x8x16xf32> -> vector<4x8x16xf32>
    "tpu.trace_stop"() : () -> ()
    %146 = vector.extract_strided_slice %145 {offsets = [0, 0, 0], sizes = [2, 8, 16], strides = [1, 1, 1]} : vector<4x8x16xf32> to vector<2x8x16xf32>
    %147 = vector.shape_cast %146 : vector<2x8x16xf32> to vector<16x16xf32>
    %148 = vector.extract_strided_slice %145 {offsets = [2, 0, 0], sizes = [2, 8, 16], strides = [1, 1, 1]} : vector<4x8x16xf32> to vector<2x8x16xf32>
    %149 = vector.shape_cast %148 : vector<2x8x16xf32> to vector<16x16xf32>
    %150 = tpu.concatenate %147, %149 in 1 : vector<16x16xf32>, vector<16x16xf32> -> vector<16x32xf32>
    %c344 = arith.constant 344 : index
    %c0_44 = arith.constant 0 : index
    %151 = vector.load %arg1[%c344, %c0_44] : memref<696x128xf32, #tpu.memory_space<vmem>>, vector<32x32xf32>
    %cst_45 = arith.constant dense<0.000000e+00> : vector<16x32xf32>
    %152 = tpu.matmul %150, %151, %cst_45 {dimension_numbers = #tpu.dot_dimension_numbers<[1], [0], [0], [1], [0, 0, 1, 1], [], []>} : vector<16x32xf32>, vector<32x32xf32>, vector<16x32xf32> -> vector<16x32xf32>
    %c376 = arith.constant 376 : index
    %c0_46 = arith.constant 0 : index
    %153 = vector.load %arg1[%c376, %c0_46] : memref<696x128xf32, #tpu.memory_space<vmem>>, vector<1x32xf32>
    %154 = vector.broadcast %153 : vector<1x32xf32> to vector<16x32xf32>
    %155 = arith.addf %152, %154 : vector<16x32xf32>
    %156 = arith.addf %113, %155 : vector<16x32xf32>
    %c384 = arith.constant 384 : index
    %c0_47 = arith.constant 0 : index
    %157 = vector.load %arg1[%c384, %c0_47] : memref<696x128xf32, #tpu.memory_space<vmem>>, vector<1x32xf32>
    %c392 = arith.constant 392 : index
    %c0_48 = arith.constant 0 : index
    %158 = vector.load %arg1[%c392, %c0_48] : memref<696x128xf32, #tpu.memory_space<vmem>>, vector<1x32xf32>
    %cst_49 = arith.constant dense<0.000000e+00> : vector<16xf32>
    %159 = vector.multi_reduction <add>, %156, %cst_49 [1] : vector<16x32xf32> to vector<16xf32>
    %160 = vector.shape_cast %159 : vector<16xf32> to vector<16x1xf32>
    %161 = arith.mulf %156, %156 : vector<16x32xf32>
    %cst_50 = arith.constant dense<0.000000e+00> : vector<16xf32>
    %162 = vector.multi_reduction <add>, %161, %cst_50 [1] : vector<16x32xf32> to vector<16xf32>
    %163 = vector.shape_cast %162 : vector<16xf32> to vector<16x1xf32>
    %cst_51 = arith.constant 3.125000e-02 : f32
    %164 = vector.broadcast %cst_51 : f32 to vector<16x1xf32>
    %165 = arith.mulf %160, %164 : vector<16x1xf32>
    %cst_52 = arith.constant 3.125000e-02 : f32
    %166 = vector.broadcast %cst_52 : f32 to vector<16x1xf32>
    %167 = arith.mulf %163, %166 : vector<16x1xf32>
    %168 = arith.mulf %165, %165 : vector<16x1xf32>
    %169 = arith.subf %167, %168 : vector<16x1xf32>
    %cst_53 = arith.constant 0.000000e+00 : f32
    %170 = vector.broadcast %cst_53 : f32 to vector<16x1xf32>
    %171 = arith.maximumf %169, %170 : vector<16x1xf32>
    %172 = vector.broadcast %165 : vector<16x1xf32> to vector<16x32xf32>
    %173 = arith.subf %156, %172 : vector<16x32xf32>
    %cst_54 = arith.constant 9.99999974E-6 : f32
    %174 = vector.broadcast %cst_54 : f32 to vector<16x1xf32>
    %175 = arith.addf %171, %174 : vector<16x1xf32>
    %176 = math.rsqrt %175 : vector<16x1xf32>
    %177 = vector.broadcast %176 : vector<16x1xf32> to vector<16x32xf32>
    %178 = arith.mulf %173, %177 : vector<16x32xf32>
    %179 = vector.broadcast %157 : vector<1x32xf32> to vector<16x32xf32>
    %180 = arith.mulf %178, %179 : vector<16x32xf32>
    %181 = vector.broadcast %158 : vector<1x32xf32> to vector<16x32xf32>
    %182 = arith.addf %180, %181 : vector<16x32xf32>
    %c400 = arith.constant 400 : index
    %c0_55 = arith.constant 0 : index
    %183 = vector.load %arg1[%c400, %c0_55] : memref<696x128xf32, #tpu.memory_space<vmem>>, vector<32x128xf32>
    %cst_56 = arith.constant dense<0.000000e+00> : vector<16x128xf32>
    %184 = tpu.matmul %182, %183, %cst_56 {dimension_numbers = #tpu.dot_dimension_numbers<[1], [0], [0], [1], [0, 0, 1, 1], [], []>} : vector<16x32xf32>, vector<32x128xf32>, vector<16x128xf32> -> vector<16x128xf32>
    %c432 = arith.constant 432 : index
    %c0_57 = arith.constant 0 : index
    %185 = vector.load %arg1[%c432, %c0_57] : memref<696x128xf32, #tpu.memory_space<vmem>>, vector<1x128xf32>
    %186 = vector.broadcast %185 : vector<1x128xf32> to vector<16x128xf32>
    %187 = arith.addf %184, %186 : vector<16x128xf32>
    %cst_58 = arith.constant 0.000000e+00 : f32
    %188 = vector.broadcast %cst_58 : f32 to vector<16x128xf32>
    %189 = arith.maximumf %187, %188 : vector<16x128xf32>
    %c440 = arith.constant 440 : index
    %c0_59 = arith.constant 0 : index
    %190 = vector.load %arg1[%c440, %c0_59] : memref<696x128xf32, #tpu.memory_space<vmem>>, vector<128x32xf32>
    %cst_60 = arith.constant dense<0.000000e+00> : vector<16x32xf32>
    %191 = tpu.matmul %189, %190, %cst_60 {dimension_numbers = #tpu.dot_dimension_numbers<[1], [0], [0], [1], [0, 0, 1, 1], [], []>} : vector<16x128xf32>, vector<128x32xf32>, vector<16x32xf32> -> vector<16x32xf32>
    %c568 = arith.constant 568 : index
    %c0_61 = arith.constant 0 : index
    %192 = vector.load %arg1[%c568, %c0_61] : memref<696x128xf32, #tpu.memory_space<vmem>>, vector<1x32xf32>
    %193 = vector.broadcast %192 : vector<1x32xf32> to vector<16x32xf32>
    %194 = arith.addf %191, %193 : vector<16x32xf32>
    %195 = arith.addf %182, %194 : vector<16x32xf32>
    %c576 = arith.constant 576 : index
    %c0_62 = arith.constant 0 : index
    %196 = vector.load %arg1[%c576, %c0_62] : memref<696x128xf32, #tpu.memory_space<vmem>>, vector<1x32xf32>
    %c584 = arith.constant 584 : index
    %c0_63 = arith.constant 0 : index
    %197 = vector.load %arg1[%c584, %c0_63] : memref<696x128xf32, #tpu.memory_space<vmem>>, vector<1x32xf32>
    %cst_64 = arith.constant dense<0.000000e+00> : vector<16xf32>
    %198 = vector.multi_reduction <add>, %195, %cst_64 [1] : vector<16x32xf32> to vector<16xf32>
    %199 = vector.shape_cast %198 : vector<16xf32> to vector<16x1xf32>
    %200 = arith.mulf %195, %195 : vector<16x32xf32>
    %cst_65 = arith.constant dense<0.000000e+00> : vector<16xf32>
    %201 = vector.multi_reduction <add>, %200, %cst_65 [1] : vector<16x32xf32> to vector<16xf32>
    %202 = vector.shape_cast %201 : vector<16xf32> to vector<16x1xf32>
    %cst_66 = arith.constant 3.125000e-02 : f32
    %203 = vector.broadcast %cst_66 : f32 to vector<16x1xf32>
    %204 = arith.mulf %199, %203 : vector<16x1xf32>
    %cst_67 = arith.constant 3.125000e-02 : f32
    %205 = vector.broadcast %cst_67 : f32 to vector<16x1xf32>
    %206 = arith.mulf %202, %205 : vector<16x1xf32>
    %207 = arith.mulf %204, %204 : vector<16x1xf32>
    %208 = arith.subf %206, %207 : vector<16x1xf32>
    %cst_68 = arith.constant 0.000000e+00 : f32
    %209 = vector.broadcast %cst_68 : f32 to vector<16x1xf32>
    %210 = arith.maximumf %208, %209 : vector<16x1xf32>
    %211 = vector.broadcast %204 : vector<16x1xf32> to vector<16x32xf32>
    %212 = arith.subf %195, %211 : vector<16x32xf32>
    %cst_69 = arith.constant 9.99999974E-6 : f32
    %213 = vector.broadcast %cst_69 : f32 to vector<16x1xf32>
    %214 = arith.addf %210, %213 : vector<16x1xf32>
    %215 = math.rsqrt %214 : vector<16x1xf32>
    %216 = vector.broadcast %215 : vector<16x1xf32> to vector<16x32xf32>
    %217 = arith.mulf %212, %216 : vector<16x32xf32>
    %218 = vector.broadcast %196 : vector<1x32xf32> to vector<16x32xf32>
    %219 = arith.mulf %217, %218 : vector<16x32xf32>
    %220 = vector.broadcast %197 : vector<1x32xf32> to vector<16x32xf32>
    %221 = arith.addf %219, %220 : vector<16x32xf32>
    %222 = vector.shape_cast %221 : vector<16x32xf32> to vector<2x8x32xf32>
    %cst_70 = arith.constant dense<0.000000e+00> : vector<2x32xf32>
    %223 = vector.multi_reduction <add>, %222, %cst_70 [1] : vector<2x8x32xf32> to vector<2x32xf32>
    %cst_71 = arith.constant 8.000000e+00 : f32
    %224 = vector.broadcast %cst_71 : f32 to vector<2x32xf32>
    %225 = arith.divf %223, %224 : vector<2x32xf32>
    %c592 = arith.constant 592 : index
    %c0_72 = arith.constant 0 : index
    %226 = vector.load %arg1[%c592, %c0_72] : memref<696x128xf32, #tpu.memory_space<vmem>>, vector<32x32xf32>
    %cst_73 = arith.constant dense<0.000000e+00> : vector<2x32xf32>
    %227 = tpu.matmul %225, %226, %cst_73 {dimension_numbers = #tpu.dot_dimension_numbers<[1], [0], [0], [1], [0, 0, 1, 1], [], []>} : vector<2x32xf32>, vector<32x32xf32>, vector<2x32xf32> -> vector<2x32xf32>
    %c624 = arith.constant 624 : index
    %c0_74 = arith.constant 0 : index
    %228 = vector.load %arg1[%c624, %c0_74] : memref<696x128xf32, #tpu.memory_space<vmem>>, vector<1x32xf32>
    %229 = vector.broadcast %228 : vector<1x32xf32> to vector<2x32xf32>
    %230 = arith.addf %227, %229 : vector<2x32xf32>
    %c632 = arith.constant 632 : index
    %c0_75 = arith.constant 0 : index
    %231 = vector.load %arg1[%c632, %c0_75] : memref<696x128xf32, #tpu.memory_space<vmem>>, vector<1x32xf32>
    %c640 = arith.constant 640 : index
    %c0_76 = arith.constant 0 : index
    %232 = vector.load %arg1[%c640, %c0_76] : memref<696x128xf32, #tpu.memory_space<vmem>>, vector<1x32xf32>
    %cst_77 = arith.constant dense<0.000000e+00> : vector<2xf32>
    %233 = vector.multi_reduction <add>, %230, %cst_77 [1] : vector<2x32xf32> to vector<2xf32>
    %234 = vector.shape_cast %233 : vector<2xf32> to vector<2x1xf32>
    %235 = arith.mulf %230, %230 : vector<2x32xf32>
    %cst_78 = arith.constant dense<0.000000e+00> : vector<2xf32>
    %236 = vector.multi_reduction <add>, %235, %cst_78 [1] : vector<2x32xf32> to vector<2xf32>
    %237 = vector.shape_cast %236 : vector<2xf32> to vector<2x1xf32>
    %cst_79 = arith.constant 3.125000e-02 : f32
    %238 = vector.broadcast %cst_79 : f32 to vector<2x1xf32>
    %239 = arith.mulf %234, %238 : vector<2x1xf32>
    %cst_80 = arith.constant 3.125000e-02 : f32
    %240 = vector.broadcast %cst_80 : f32 to vector<2x1xf32>
    %241 = arith.mulf %237, %240 : vector<2x1xf32>
    %242 = arith.mulf %239, %239 : vector<2x1xf32>
    %243 = arith.subf %241, %242 : vector<2x1xf32>
    %cst_81 = arith.constant 0.000000e+00 : f32
    %244 = vector.broadcast %cst_81 : f32 to vector<2x1xf32>
    %245 = arith.maximumf %243, %244 : vector<2x1xf32>
    %246 = vector.broadcast %239 : vector<2x1xf32> to vector<2x32xf32>
    %247 = arith.subf %230, %246 : vector<2x32xf32>
    %cst_82 = arith.constant 9.99999974E-6 : f32
    %248 = vector.broadcast %cst_82 : f32 to vector<2x1xf32>
    %249 = arith.addf %245, %248 : vector<2x1xf32>
    %250 = math.rsqrt %249 : vector<2x1xf32>
    %251 = vector.broadcast %250 : vector<2x1xf32> to vector<2x32xf32>
    %252 = arith.mulf %247, %251 : vector<2x32xf32>
    %253 = vector.broadcast %231 : vector<1x32xf32> to vector<2x32xf32>
    %254 = arith.mulf %252, %253 : vector<2x32xf32>
    %255 = vector.broadcast %232 : vector<1x32xf32> to vector<2x32xf32>
    %256 = arith.addf %254, %255 : vector<2x32xf32>
    %257 = arith.mulf %256, %256 : vector<2x32xf32>
    %cst_83 = arith.constant dense<0.000000e+00> : vector<2xf32>
    %258 = vector.multi_reduction <add>, %257, %cst_83 [1] : vector<2x32xf32> to vector<2xf32>
    %259 = vector.shape_cast %258 : vector<2xf32> to vector<2x1xf32>
    %c648 = arith.constant 648 : index
    %c0_84 = arith.constant 0 : index
    %260 = vector.load %arg1[%c648, %c0_84] : memref<696x128xf32, #tpu.memory_space<vmem>>, vector<32x8xf32>
    %cst_85 = arith.constant dense<0.000000e+00> : vector<2x8xf32>
    %261 = tpu.matmul %256, %260, %cst_85 {dimension_numbers = #tpu.dot_dimension_numbers<[1], [0], [0], [1], [0, 0, 1, 1], [], []>} : vector<2x32xf32>, vector<32x8xf32>, vector<2x8xf32> -> vector<2x8xf32>
    %c680 = arith.constant 680 : index
    %c0_86 = arith.constant 0 : index
    %262 = vector.load %arg1[%c680, %c0_86] : memref<696x128xf32, #tpu.memory_space<vmem>>, vector<1x8xf32>
    %263 = vector.broadcast %259 : vector<2x1xf32> to vector<2x8xf32>
    %264 = vector.broadcast %262 : vector<1x8xf32> to vector<2x8xf32>
    %265 = arith.addf %263, %264 : vector<2x8xf32>
    %cst_87 = arith.constant 2.000000e+00 : f32
    %266 = vector.broadcast %cst_87 : f32 to vector<2x8xf32>
    %267 = arith.mulf %266, %261 : vector<2x8xf32>
    %268 = arith.subf %265, %267 : vector<2x8xf32>
    %cst_88 = arith.constant 0.000000e+00 : f32
    %269 = vector.broadcast %cst_88 : f32 to vector<2x8xf32>
    %270 = arith.maximumf %268, %269 : vector<2x8xf32>
    %271 = math.sqrt %270 : vector<2x8xf32>
    %cst_89 = arith.constant 0.769230782 : f32
    %272 = vector.broadcast %cst_89 : f32 to vector<2x8xf32>
    %273 = arith.mulf %271, %272 : vector<2x8xf32>
    %cst_90 = arith.constant 2.23606801 : f32
    %274 = vector.broadcast %cst_90 : f32 to vector<2x8xf32>
    %275 = arith.mulf %274, %273 : vector<2x8xf32>
    %cst_91 = arith.constant 1.000000e+00 : f32
    %276 = vector.broadcast %cst_91 : f32 to vector<2x8xf32>
    %277 = arith.addf %276, %275 : vector<2x8xf32>
    %cst_92 = arith.constant 1.66666663 : f32
    %278 = vector.broadcast %cst_92 : f32 to vector<2x8xf32>
    %279 = arith.mulf %278, %273 : vector<2x8xf32>
    %280 = arith.mulf %279, %273 : vector<2x8xf32>
    %281 = arith.addf %277, %280 : vector<2x8xf32>
    %cst_93 = arith.constant -2.23606801 : f32
    %282 = vector.broadcast %cst_93 : f32 to vector<2x8xf32>
    %283 = arith.mulf %282, %273 : vector<2x8xf32>
    %284 = math.exp %283 : vector<2x8xf32>
    %285 = arith.mulf %281, %284 : vector<2x8xf32>
    %cst_94 = arith.constant -5.000000e-01 : f32
    %286 = vector.broadcast %cst_94 : f32 to vector<2x8xf32>
    %287 = arith.mulf %286, %270 : vector<2x8xf32>
    %cst_95 = arith.constant 1.23456788 : f32
    %288 = vector.broadcast %cst_95 : f32 to vector<2x8xf32>
    %289 = arith.mulf %287, %288 : vector<2x8xf32>
    %290 = math.exp %289 : vector<2x8xf32>
    %291 = arith.addf %285, %290 : vector<2x8xf32>
    %c688 = arith.constant 688 : index
    %c0_96 = arith.constant 0 : index
    %292 = vector.load %arg1[%c688, %c0_96] : memref<696x128xf32, #tpu.memory_space<vmem>>, vector<1x8xf32>
    %293 = vector.broadcast %292 : vector<1x8xf32> to vector<2x8xf32>
    %294 = arith.mulf %291, %293 : vector<2x8xf32>
    %cst_97 = arith.constant dense<0.000000e+00> : vector<2xf32>
    %295 = vector.multi_reduction <add>, %294, %cst_97 [1] : vector<2x8xf32> to vector<2xf32>
    %296 = vector.shape_cast %295 : vector<2xf32> to vector<2x1xf32>
    %cst_98 = arith.constant 2.500000e-01 : f32
    %297 = vector.broadcast %cst_98 : f32 to vector<2x1xf32>
    %298 = arith.addf %296, %297 : vector<2x1xf32>
    %c0_99 = arith.constant 0 : index
    %c0_100 = arith.constant 0 : index
    %299 = vector.load %arg2[%c0_99, %c0_100] : memref<2x1xf32, #tpu.memory_space<vmem>>, vector<2x1xf32>
    tpu.vector_store %arg2[%c0_99, %c0_100], %298 {strides = array<i32>} : memref<2x1xf32, #tpu.memory_space<vmem>>, vector<2x1xf32>,
    return
  }
}

</mosaic_0001>

<bundles_post_ra>
// kernel: residual_model_forward.1
= control target key start
LH: loop header
LB: loop body
LE: loop exit
PB: predicated region body
PF: predicated region fallthrough
CT: control target
= control target key end

     0   :  { %7 = vsyncpa [#allocation3], 0  ;;  %s3284_s9 = smov [#allocation2]   ;;  %s3556_s0 = inlined_call_operand.vmem [shape: f32[16,6], index: 0, kind: input, shape index: {}]   ;;  %s3557_s1 = inlined_call_operand.hbm [shape: f32[696,128], index: 1, kind: input, shape index: {}]   ;;  %s3558_s2 = inlined_call_operand.vmem [shape: f32[2,1], index: 2, kind: output, shape index: {}]  }
   0x1   :  { %s15_s10 = sshll.u32 %s3284_s9, 4  ;;  %s3260_s13 = scalar_lea.hbm %s3557_s1, 11136  ;;  %s16_s10 = int_to_ptr.vmem [resolvable:$true] %s15_s10 }
   0x2   :  { %p3261_p0 = scmp.ne.s32.totalorder %s3557_s1, %s3260_s13  ;;  %p3264_p1 = scmp.lt.u32.totalorder %s3260_s13, %s3557_s1 }
   0x4   :  { %p3266_p2 = pnand %p3264_p1, %p3261_p0 }
   0x6   :  { %3269 = shalt.err (!%p3266_p2)
}
   0x7   :  { %s3270_s18 = scalar_lea.vmem %s16_s10, 11136  ;;  %p3275_p4 = scmp.lt.s32.totalorder %s16_s10, %s16_s10 }
   0x8   :  { %p3271_p3 = scmp.ne.s32.totalorder %s16_s10, %s3270_s18  ;;  %p3276_p5 = scmp.lt.s32.totalorder %s3270_s18, %s3270_s18 }
   0xa   :  { %p3277_p6 = por %p3276_p5, %p3275_p4 }
   0xc   :  { %p3278_p7 = pnand %p3277_p6, %p3271_p3 }
   0xe   :  { %3281 = shalt.err (!%p3278_p7)
}
   0xf   :  { %s3285_s19 = smov 128   ;;  %s3286_s20 = smov 8  }
  0x10   :  { %21 = dma.hbm_to_vmem [thread:$0]  %s3557_s1, 11136, %s16_s10, [#allocation3], %s3285_s19, %s3285_s19, %s3286_s20  }
  0x11   :  { %3282 = dma.done.wait [#allocation3], 11136  }
  0x12   :  { %3283 = vsyncadd [#allocation3], 4294956160  ;;  %vm40_vm0 = vcmask 1045504   ;;  %vm33_vm1 = vcmask 48128   ;;  %v27_v0 = vld [vmem:[#allocation2] sm:$0x3f] }
  0x13   :  { %v25_v1 = vld [vmem:[%s3556_s0] sm:$0xff]  ;;  %v26_v2 = vld [vmem:[%s3556_s0 + $0x8] sm:$0xff]  ;;  %2827 = vmatprep.subr.msk.mxu0 %vm40_vm0, %v27_v0  ;;  %v121_v6 = vld [vmem:[#allocation2 + $0x20] sm:$0xff]  ;;  %vm128_vm2 = vcmask 261120   ;;  %v3287_v14 = vmov 0.0   ;;  %vm3288_vm3 = vmmov 0  }
  0x14   :  { %2829 = vmatprep.mubr.msk.f32.mxu0 %vm33_vm1, %v25_v1  ;;  %v119_v3 = vld [vmem:[#allocation2 + $0x10] sm:$0xff]  ;;  %v120_v4 = vld [vmem:[#allocation2 + $0x18] sm:$0xff]  ;;  %2828 = vmatpush3.msk.msra.mxu0 %vm40_vm0, %v27_v0  ;;  %v122_v7 = vld [vmem:[#allocation2 + $0x28] sm:$0xff]  ;;  %s3289_s0 = smov 96   ;;  %s3290_s1 = smov 112   ;;  %vm218_vm4 = vcmask 130048  }
  0x15   :  { %v3070_v5 = vpack.c.bf16 %v120_v4, %v119_v3  ;;  %2830 = vmatmul.mubr.msk.f32.vlgmr.msra.gmra.mrb[0].mxu0 %vm33_vm1, %v26_v2  ;;  %v3074_v8 = vpack.c.bf16 %v122_v7, %v121_v6  ;;  %v2647_v9 = vld [vmem:[#allocation2 + $0x8] ss:$0 sm:$0xff]  ;;  %2853 = vmatprep.subr.mxu1 %v3287_v14  ;;  %v2651_v15 = vld [vmem:[#allocation2 + $0x30] ss:$0 sm:$0xff]  ;;  %vm521_vm5 = vcmask 64512   ;;  %s3291_s27 = smov 64  }
  0x16   :  { %2855 = vmatprep.mubr.msk.f32.mxu1 %vm3288_vm3, %v3287_v14  ;;  %s3292_s28 = smov 16   ;;  %vm2414_vm6 = vcmask 1041409   ;;  %vm2490_vm7 = vcmask 254976   ;;  %vm2635_vm10 = vcmask 58368   ;;  %vm2640_vm11 = vcmask 1024  }
  0x17   :  { %3071 = vmatprep.subr.bf16.mxu0 %v3070_v5 }
  0x18   :  { %3073 = vmatpush3.bf16.msra.mxu0 %v3070_v5 }
  0x19   :  { %3075 = vmatprep.subr.bf16.mxu0 %v3074_v8 }
  0x1c   :  { %3077 = vmatpush3.bf16.msra.mxu0 %v3074_v8 }
  0x1d   :  { %2843 = vmatprep.subr.mxu0 %v3287_v14 }
  0xe8   :  { %v2831_v10 = vpop.f32.mrb[0].mxu0 }
  0xe9   :  { %v110_v11 = vpop.f32.mrb[1].mxu0  ;;  %v3329_v13 = vadd.f32 %v2831_v10, %v2647_v9  ;;  %v880_v10 = vld [vmem:[#allocation2 + $0x38] sm:$0xff] }
  0xea   :  { %v3327_v12 = vadd.f32 %v2647_v9, %v110_v11  ;;  %v881_v11 = vld [vmem:[#allocation2 + $0x40] sm:$0xff] }
  0xec   :  { %2840 = vmatprep.mubr.msk.f32.mxu0 %vm128_vm2, %v3327_v12 }
  0xed   :  { %2841 = vmatmul.mubr.msk.f32.vlgmr.msra.gmra.mrb[2].mxu0 %vm128_vm2, %v3329_v13 }
  0xee   :  { %2845 = vmatprep.mubr.msk.f32.mxu0 %vm3288_vm3, %v3287_v14 }
 0x1c0   :  { %v2842_v16 = vpop.f32.mrb[2].mxu0 }
 0x1c1   :  { %v201_v17 = vpop.f32.mrb[3].mxu0  ;;  %v3343_v19 = vadd.f32 %v2842_v16, %v2651_v15 }
 0x1c2   :  { %v202_v18 = vadd.f32 %v2651_v15, %v201_v17  ;;  %v3078_v15 = vpack.c.bf16 %v881_v11, %v880_v10 }
 0x1c4   :  { %216 = vrot.lane.b32.xlu1 %v202_v18, %s3289_s0  ;;  %212 = vrot.lane.b32.xlu0 %v202_v18, %s3290_s1 }
 0x1c8   :  { %293 = vrot.lane.b32.xlu1 %v3343_v19, %s3289_s0  ;;  %214 = vrot.lane.b32.xlu0 %v3343_v19, %s3290_s1 }
 0x236   :  { %v217_v20 = vpop.permute.xlu1 %216  ;;  %v213_v21 = vpop.permute.xlu0 %212 }
 0x237   :  { %2844 = vmatpush3.xpose.msk.msra.mxu0 %vm218_vm4, %v217_v20  ;;  %369 = vrot.lane.b32.xlu0 %v213_v21, %s3289_s0 }
 0x238   :  { %2848 = vmatprep.subr.mxu0 %v3287_v14 }
 0x23a   :  { %2846 = vmatmul.mubr.msk.f32.vlgmr.msra.gmra.mrb[4].mxu0 %vm218_vm4, %v202_v18  ;;  %v294_v22 = vpop.permute.xlu1 %293  ;;  %v3353_v23 = vpop.permute.xlu0 %214 }
 0x23b   :  { %2849 = vmatpush3.xpose.msk.msra.mxu0 %vm218_vm4, %v294_v22  ;;  %445 = vrot.lane.b32.xlu1 %v3353_v23, %s3289_s0 }
 0x23c   :  { %2850 = vmatprep.mubr.msk.f32.mxu0 %vm3288_vm3, %v3287_v14  ;;  %2858 = vmatprep.subr.mxu0 %v3287_v14 }
 0x23e   :  { %2851 = vmatmul.mubr.msk.f32.vlgmr.msra.gmra.mrb[6].mxu0 %vm218_vm4, %v3343_v19 }
 0x23f   :  { %2860 = vmatprep.mubr.msk.f32.mxu0 %vm3288_vm3, %v3287_v14 }
 0x2a9   :  { %v370_v24 = vpop.permute.xlu0 %369 }
 0x2aa   :  { %2854 = vmatpush3.xpose.msk.msra.mxu1 %vm218_vm4, %v370_v24 }
 0x2ab   :  { %2863 = vmatprep.subr.mxu1 %v3287_v14 }
 0x2ad   :  { %v446_v25 = vpop.permute.xlu1 %445  ;;  %2856 = vmatmul.mubr.msk.f32.vlgmr.msra.gmra.mrb[0].mxu1 %vm218_vm4, %v213_v21 }
 0x2ae   :  { %2859 = vmatpush3.xpose.msk.msra.mxu0 %vm218_vm4, %v446_v25  ;;  %2865 = vmatprep.mubr.msk.f32.mxu1 %vm3288_vm3, %v3287_v14 }
 0x2af   :  { %2868 = vmatprep.subr.mxu0 %v3287_v14 }
 0x2b1   :  { %2861 = vmatmul.mubr.msk.f32.vlgmr.msra.gmra.mrb[8].mxu0 %vm218_vm4, %v3353_v23 }
 0x2b2   :  { %2870 = vmatprep.mubr.msk.f32.mxu0 %vm3288_vm3, %v3287_v14 }
 0x30d   :  { %v289_v26 = vpop.f32.mrb[4].mxu0 }
 0x30e   :  { %v2847_v27 = vpop.f32.mrb[5].mxu0  ;;  %v522_v28 = vsel %vm521_vm5, %v289_v26, -inf }
 0x30f   :  { %523 = vmax.xlane.f32.xlu0 %v522_v28 }
 0x311   :  { %v365_v29 = vpop.f32.mrb[6].mxu0 }
 0x312   :  { %v2852_v30 = vpop.f32.mrb[7].mxu0  ;;  %v525_v31 = vsel %vm521_vm5, %v365_v29, -inf }
 0x313   :  { %526 = vmax.xlane.f32.xlu1 %v525_v31  ;;  %v2666_v31 = vld [vmem:[#allocation2 + $0x58] ss:$0 sm:$0xff] }
 0x324   :  { %566 = vrot.lane.b32.xlu1 %v202_v18, %s3291_s27  ;;  %v882_v18 = vld [vmem:[#allocation2 + $0x48] sm:$0xff] }
 0x380   :  { %v441_v32 = vpop.f32.mrb[0].mxu1 }
 0x381   :  { %v2857_v33 = vpop.f32.mrb[1].mxu1  ;;  %v528_v34 = vsel %vm521_vm5, %v441_v32, -inf }
 0x382   :  { %529 = vmax.xlane.f32.xlu0 %v528_v34 }
 0x384   :  { %v517_v35 = vpop.f32.mrb[8].mxu0 }
 0x385   :  { %v2862_v36 = vpop.f32.mrb[9].mxu0  ;;  %v531_v37 = vsel %vm521_vm5, %v517_v35, -inf }
 0x386   :  { %532 = vmax.xlane.f32.xlu0 %v531_v37 }
 0x39c   :  { %v524_v38 = vpop.xlane.xlu0 %523 }
 0x39d   :  { %v534_v39 = vsub.f32 %v289_v26, %v524_v38 }
 0x39f   :  { %v538_v40 = vmul.f32 1.442695, %v534_v39 }
 0x3a0   :  { %v527_v41 = vpop.xlane.xlu1 %526 }
 0x3a1   :  { %3204 = vpow2.f32 %v538_v40  ;;  %v535_v42 = vsub.f32 %v365_v29, %v527_v41 }
 0x3a3   :  { %v540_v43 = vmul.f32 1.442695, %v535_v42  ;;  %v1018_v42 = vld [vmem:[#allocation2 + $0x70] sm:$0xff] }
 0x3a4   :  { %v567_v44 = vpop.permute.xlu1 %566 }
 0x3a5   :  { %3206 = vpow2.f32 %v540_v43  ;;  %2864 = vmatpush3.msra.mxu1 %v567_v44  ;;  %v1019_v43 = vld [vmem:[#allocation2 + $0x78] sm:$0xff]  ;;  %v1020_v44 = vld [vmem:[#allocation2 + $0x80] sm:$0xff] }
 0x3a6   :  { %2873 = vmatprep.subr.mxu1 %v3287_v14 }
 0x3ab   :  { %v3205_v45 = vpop.eup %3204 }
 0x3ac   :  { %v546_v46 = vsel %vm521_vm5, %v3205_v45, 0.0 }
 0x3ad   :  { %547 = vadd.xlane.f32.xlu1 %v546_v46  ;;  %v1021_v46 = vld [vmem:[#allocation2 + $0x88] sm:$0xff] }
 0x3af   :  { %v3207_v47 = vpop.eup %3206 }
 0x3b0   :  { %v549_v48 = vsel %vm521_vm5, %v3207_v47, 0.0 }
 0x3b1   :  { %550 = vadd.xlane.f32.xlu0 %v549_v48  ;;  %v1110_v48 = vld [vmem:[#allocation2 + $0x98] sm:$0xff] }
 0x3be   :  { %718 = vrot.lane.b32.xlu1 %v213_v21, %s3291_s27 }
 0x40f   :  { %v530_v49 = vpop.xlane.xlu0 %529 }
 0x410   :  { %v536_v50 = vsub.f32 %v441_v32, %v530_v49  ;;  %v1111_v49 = vld [vmem:[#allocation2 + $0xa0] sm:$0xff] }
 0x412   :  { %v542_v51 = vmul.f32 1.442695, %v536_v50  ;;  %v1112_v50 = vld [vmem:[#allocation2 + $0xa8] sm:$0xff] }
 0x413   :  { %v533_v52 = vpop.xlane.xlu0 %532 }
 0x414   :  { %3208 = vpow2.f32 %v542_v51  ;;  %v537_v53 = vsub.f32 %v517_v35, %v533_v52  ;;  %v3094_v51 = vpack.c.bf16 %v1111_v49, %v1110_v48  ;;  %v1113_v52 = vld [vmem:[#allocation2 + $0xb0] sm:$0xff] }
 0x416   :  { %v544_v54 = vmul.f32 1.442695, %v537_v53  ;;  %v3098_v53 = vpack.c.bf16 %v1113_v52, %v1112_v50 }
 0x418   :  { %3210 = vpow2.f32 %v544_v54  ;;  %v1114_v54 = vld [vmem:[#allocation2 + $0xb8] sm:$0xff] }
 0x41e   :  { %v3209_v55 = vpop.eup %3208 }
 0x41f   :  { %v552_v56 = vsel %vm521_vm5, %v3209_v55, 0.0 }
 0x420   :  { %553 = vadd.xlane.f32.xlu1 %v552_v56 }
 0x422   :  { %v3211_v57 = vpop.eup %3210 }
 0x423   :  { %v555_v58 = vsel %vm521_vm5, %v3211_v57, 0.0 }
 0x424   :  { %556 = vadd.xlane.f32.xlu0 %v555_v58  ;;  %v1117_v58 = vld [vmem:[#allocation2 + $0xd0] sm:$0xff] }
 0x431   :  { %794 = vrot.lane.b32.xlu1 %v3353_v23, %s3291_s27 }
 0x43a   :  { %v548_v59 = vpop.xlane.xlu1 %547  ;;  %642 = vrot.lane.b32.xlu0 %v3343_v19, %s3291_s27  ;;  %v883_v19 = vld [vmem:[#allocation2 + $0x50] sm:$0xff] }
 0x43b   :  { %3212 = vrcp.f32 %v548_v59  ;;  %v3082_v20 = vpack.c.bf16 %v883_v19, %v882_v18 }
 0x43e   :  { %v719_v62 = vpop.permute.xlu1 %718  ;;  %v551_v63 = vpop.xlane.xlu0 %550 }
 0x43f   :  { %3214 = vrcp.f32 %v551_v63  ;;  %v1120_v63 = vld [vmem:[#allocation2 + $0xe8] sm:$0xff] }
 0x445   :  { %v3213_v60 = vpop.eup %3212 }
 0x446   :  { %v562_v61 = vmul.f32 %v3213_v60, %v3205_v45  ;;  %v3086_v45 = vpack.c.bf16 %v1019_v43, %v1018_v42  ;;  %v1118_v60 = vld [vmem:[#allocation2 + $0xd8] sm:$0xff] }
 0x448   :  { %2866 = vmatmul.mubr.msk.f32.vlgmr.msra.gmra.mrb[2].mxu1 %vm521_vm5, %v562_v61  ;;  %v1119_v61 = vld [vmem:[#allocation2 + $0xe0] sm:$0xff] }
 0x449   :  { %2874 = vmatpush3.msra.mxu1 %v719_v62  ;;  %2875 = vmatprep.mubr.msk.f32.mxu1 %vm3288_vm3, %v3287_v14  ;;  %v3215_v2 = vpop.eup %3214  ;;  %v3110_v62 = vpack.c.bf16 %v1119_v61, %v1118_v60  ;;  %v1257_v61 = vld [vmem:[#allocation2 + $0x148] sm:$0xff] }
 0x44a   :  { %v563_v3 = vmul.f32 %v3215_v2, %v3207_v47  ;;  %3079 = vmatprep.subr.bf16.mxu1 %v3078_v15  ;;  %v3090_v47 = vpack.c.bf16 %v1021_v46, %v1020_v44  ;;  %v1122_v2 = vld [vmem:[#allocation2 + $0xf8] sm:$0xff] }
 0x44b   :  { %v2674_v44 = vld [vmem:[#allocation2 + $0x118] ss:$0 sm:$0xff] }
 0x4ad   :  { %v554_v0 = vpop.xlane.xlu1 %553 }
 0x4ae   :  { %3216 = vrcp.f32 %v554_v0  ;;  %v1121_v0 = vld [vmem:[#allocation2 + $0xf0] sm:$0xff] }
 0x4b1   :  { %v557_v1 = vpop.xlane.xlu0 %556  ;;  %v795_v5 = vpop.permute.xlu1 %794 }
 0x4b2   :  { %3218 = vrcp.f32 %v557_v1  ;;  %v3114_v1 = vpack.c.bf16 %v1121_v0, %v1120_v63 }
 0x4b5   :  { %v643_v4 = vpop.permute.xlu0 %642 }
 0x4b6   :  { %2869 = vmatpush3.msra.mxu0 %v643_v4 }
 0x4b7   :  { %2871 = vmatmul.mubr.msk.f32.vlgmr.msra.gmra.mrb[10].mxu0 %vm521_vm5, %v563_v3  ;;  %2878 = vmatprep.subr.mxu0 %v3287_v14  ;;  %v1123_v3 = vld [vmem:[#allocation2 + $0x100] sm:$0xff] }
 0x4b8   :  { %v3217_v6 = vpop.eup %3216  ;;  %2879 = vmatpush3.msra.mxu0 %v795_v5  ;;  %2880 = vmatprep.mubr.msk.f32.mxu0 %vm3288_vm3, %v3287_v14  ;;  %v3118_v4 = vpack.c.bf16 %v1123_v3, %v1122_v2 }
 0x4b9   :  { %v564_v7 = vmul.f32 %v3217_v6, %v3209_v55  ;;  %3087 = vmatprep.subr.bf16.mxu0 %v3086_v45  ;;  %v1115_v55 = vld [vmem:[#allocation2 + $0xc0] sm:$0xff] }
 0x4ba   :  { %v3102_v56 = vpack.c.bf16 %v1115_v55, %v1114_v54 }
 0x4bb   :  { %2876 = vmatmul.mubr.msk.f32.vlgmr.msra.gmra.mrb[4].mxu1 %vm521_vm5, %v564_v7 }
 0x4bc   :  { %v3219_v8 = vpop.eup %3218  ;;  %3081 = vmatpush3.bf16.msra.mxu1 %v3078_v15 }
 0x4bd   :  { %v565_v9 = vmul.f32 %v3219_v8, %v3211_v57  ;;  %3083 = vmatprep.subr.bf16.mxu1 %v3082_v20  ;;  %v1116_v57 = vld [vmem:[#allocation2 + $0xc8] sm:$0xff] }
 0x4be   :  { %v3106_v59 = vpack.c.bf16 %v1117_v58, %v1116_v57  ;;  %v1254_v57 = vld [vmem:[#allocation2 + $0x130] sm:$0xff]  ;;  %v1255_v58 = vld [vmem:[#allocation2 + $0x138] sm:$0xff] }
 0x4bf   :  { %2881 = vmatmul.mubr.msk.f32.vlgmr.msra.gmra.mrb[12].mxu0 %vm521_vm5, %v565_v9  ;;  %v3126_v60 = vpack.c.bf16 %v1255_v58, %v1254_v57 }
 0x4c0   :  { %3085 = vmatpush3.bf16.msra.mxu1 %v3082_v20  ;;  %3089 = vmatpush3.bf16.msra.mxu0 %v3086_v45 }
 0x4c1   :  { %3091 = vmatprep.subr.bf16.mxu0 %v3090_v47  ;;  %3095 = vmatprep.subr.bf16.mxu1 %v3094_v51 }
 0x4c4   :  { %3093 = vmatpush3.bf16.msra.mxu0 %v3090_v47 }
 0x4c5   :  { %3127 = vmatprep.subr.bf16.mxu0 %v3126_v60 }
 0x51b   :  { %v638_v16 = vpop.f32.mrb[2].mxu1 }
 0x51c   :  { %v2867_v17 = vpop.f32.mrb[3].mxu1 }
 0x58a   :  { %v714_v21 = vpop.f32.mrb[10].mxu0 }
 0x58b   :  { %v2872_v22 = vpop.f32.mrb[11].mxu0 }
 0x58e   :  { %v790_v23 = vpop.f32.mrb[4].mxu1 }
 0x58f   :  { %v2877_v24 = vpop.f32.mrb[5].mxu1  ;;  %872 = vrot.lane.b32.xlu0 %v790_v23, %s3292_s28 }
 0x592   :  { %v866_v25 = vpop.f32.mrb[12].mxu0 }
 0x593   :  { %874 = vrot.lane.b32.xlu1 %v866_v25, %s3292_s28  ;;  %v2882_v26 = vpop.f32.mrb[13].mxu0 }
 0x594   :  { %v2669_v26 = vld [vmem:[#allocation2 + $0x60] ss:$0 sm:$0xff] }
 0x601   :  { %v873_v27 = vpop.permute.xlu0 %872 }
 0x602   :  { %v878_v28 = vsel %vm218_vm4, %v638_v16, %v873_v27 }
 0x603   :  { %2891 = vmatprep.mubr.msk.f32.mxu1 %vm128_vm2, %v878_v28  ;;  %v2670_v28 = vld [vmem:[#allocation2 + $0x68] ss:$0 sm:$0xff] }
 0x605   :  { %v875_v29 = vpop.permute.xlu1 %874 }
 0x606   :  { %v879_v30 = vsel %vm218_vm4, %v714_v21, %v875_v29 }
 0x607   :  { %2892 = vmatmul.mubr.msk.f32.vlgmr.msra.gmra.mrb[6].mxu1 %vm128_vm2, %v879_v30 }
 0x608   :  { %3097 = vmatpush3.bf16.msra.mxu1 %v3094_v51 }
 0x609   :  { %3099 = vmatprep.subr.bf16.mxu1 %v3098_v53 }
 0x60c   :  { %3101 = vmatpush3.bf16.msra.mxu1 %v3098_v53 }
 0x60d   :  { %3103 = vmatprep.subr.bf16.mxu1 %v3102_v56 }
 0x610   :  { %3105 = vmatpush3.bf16.msra.mxu1 %v3102_v56 }
 0x611   :  { %3107 = vmatprep.subr.bf16.mxu1 %v3106_v59 }
 0x614   :  { %3109 = vmatpush3.bf16.msra.mxu1 %v3106_v59  ;;  %v1256_v59 = vld [vmem:[#allocation2 + $0x140] sm:$0xff] }
 0x615   :  { %3111 = vmatprep.subr.bf16.mxu1 %v3110_v62 }
 0x618   :  { %3113 = vmatpush3.bf16.msra.mxu1 %v3110_v62  ;;  %v3130_v62 = vpack.c.bf16 %v1257_v61, %v1256_v59 }
 0x619   :  { %3115 = vmatprep.subr.bf16.mxu1 %v3114_v1 }
 0x61c   :  { %3117 = vmatpush3.bf16.msra.mxu1 %v3114_v1 }
 0x61d   :  { %3119 = vmatprep.subr.bf16.mxu1 %v3118_v4 }
 0x620   :  { %3121 = vmatpush3.bf16.msra.mxu1 %v3118_v4 }
 0x6da   :  { %v2893_v32 = vpop.f32.mrb[6].mxu1 }
 0x6db   :  { %v967_v33 = vadd.f32 %v2893_v32, %v2666_v31  ;;  %v961_v34 = vpop.f32.mrb[7].mxu1 }
 0x6dc   :  { %v962_v35 = vadd.f32 %v2666_v31, %v961_v34 }
 0x6dd   :  { %v3407_v36 = vadd.f32 %v967_v33, %v3329_v13 }
 0x6de   :  { %v3410_v37 = vadd.f32 %v962_v35, %v3327_v12 }
 0x6df   :  { %v977_v38 = vsel %vm128_vm2, %v3407_v36, 0.0  ;;  %v981_v13 = vmul.f32 %v3407_v36, %v3407_v36 }
 0x6e0   :  { %978 = vadd.xlane.f32.xlu1 %v977_v38  ;;  %v974_v39 = vsel %vm128_vm2, %v3410_v37, 0.0  ;;  %v980_v40 = vmul.f32 %v3410_v37, %v3410_v37  ;;  %v1124_v38 = vld [vmem:[#allocation2 + $0x108] sm:$0xff] }
 0x6e1   :  { %975 = vadd.xlane.f32.xlu0 %v974_v39  ;;  %v985_v12 = vsel %vm128_vm2, %v981_v13, 0.0  ;;  %v1125_v39 = vld [vmem:[#allocation2 + $0x110] sm:$0xff] }
 0x6e2   :  { %v982_v41 = vsel %vm128_vm2, %v980_v40, 0.0  ;;  %v3122_v40 = vpack.c.bf16 %v1125_v39, %v1124_v38 }
 0x6e4   :  { %3123 = vmatprep.subr.bf16.mxu1 %v3122_v40 }
 0x6e5   :  { %983 = vadd.xlane.f32.xlu0 %v982_v41  ;;  %3125 = vmatpush3.bf16.msra.mxu1 %v3122_v40 }
 0x6e6   :  { %2981 = vmatprep.subr.mxu1 %v3287_v14 }
 0x6e9   :  { %986 = vadd.xlane.f32.xlu0 %v985_v12 }
 0x76d   :  { %v979_v7 = vpop.xlane.xlu1 %978 }
 0x76e   :  { %v976_v5 = vpop.xlane.xlu0 %975  ;;  %v989_v9 = vmul.f32 0.03125, %v979_v7 }
 0x76f   :  { %v988_v6 = vmul.f32 0.03125, %v976_v5 }
 0x770   :  { %v993_v17 = vmul.f32 %v989_v9, %v989_v9  ;;  %v999_v29 = vsub.f32 %v3407_v36, %v989_v9 }
 0x771   :  { %v992_v10 = vmul.f32 %v988_v6, %v988_v6  ;;  %v998_v24 = vsub.f32 %v3410_v37, %v988_v6  ;;  %v2671_v37 = vld [vmem:[#allocation2 + $0x90] ss:$0 sm:$0xff] }
 0x772   :  { %v984_v8 = vpop.xlane.xlu0 %983 }
 0x773   :  { %v990_v11 = vmul.f32 0.03125, %v984_v8 }
 0x775   :  { %v994_v15 = vsub.f32 %v990_v11, %v992_v10 }
 0x776   :  { %v987_v16 = vpop.xlane.xlu0 %986 }
 0x777   :  { %v996_v18 = vmax.f32 %v994_v15, 0.0  ;;  %v991_v19 = vmul.f32 0.03125, %v987_v16 }
 0x779   :  { %v1000_v20 = vadd.f32 1e-05, %v996_v18  ;;  %v995_v21 = vsub.f32 %v991_v19, %v993_v17 }
 0x77b   :  { %3220 = vrsqrt.f32 %v1000_v20  ;;  %v997_v22 = vmax.f32 %v995_v21, 0.0  ;;  %v2675_v21 = vld [vmem:[#allocation2 + $0x120] ss:$0 sm:$0xff] }
 0x77d   :  { %v1001_v23 = vadd.f32 1e-05, %v997_v22 }
 0x77f   :  { %3222 = vrsqrt.f32 %v1001_v23 }
 0x785   :  { %v3221_v25 = vpop.eup %3220 }
 0x786   :  { %v1004_v27 = vmul.f32 %v3221_v25, %v998_v24  ;;  %v2676_v25 = vld [vmem:[#allocation2 + $0x128] ss:$0 sm:$0xff] }
 0x788   :  { %v1010_v30 = vmul.f32 %v2669_v26, %v1004_v27 }
 0x789   :  { %v3223_v31 = vpop.eup %3222 }
 0x78a   :  { %v1005_v32 = vmul.f32 %v3223_v31, %v999_v29  ;;  %v1016_v33 = vadd.f32 %v2670_v28, %v1010_v30  ;;  %v2677_v30 = vld [vmem:[#allocation2 + $0x150] ss:$0 sm:$0xff] }
 0x78c   :  { %v1011_v34 = vmul.f32 %v2669_v26, %v1005_v32  ;;  %2902 = vmatprep.mubr.msk.f32.mxu0 %vm128_vm2, %v1016_v33 }
 0x78e   :  { %v1017_v35 = vadd.f32 %v2670_v28, %v1011_v34 }
 0x790   :  { %2903 = vmatmul.mubr.msk.f32.vlgmr.msra.gmra.mrb[14].mxu0 %vm128_vm2, %v1017_v35 }
 0x791   :  { %3129 = vmatpush3.bf16.msra.mxu0 %v3126_v60 }
 0x792   :  { %3131 = vmatprep.subr.bf16.mxu0 %v3130_v62 }
 0x795   :  { %3133 = vmatpush3.bf16.msra.mxu0 %v3130_v62 }
 0x796   :  { %2951 = vmatprep.subr.mxu0 %v3287_v14 }
 0x863   :  { %v2904_v41 = vpop.f32.mrb[14].mxu0 }
 0x864   :  { %v1105_v36 = vadd.f32 %v2904_v41, %v2671_v37  ;;  %v1099_v13 = vpop.f32.mrb[15].mxu0 }
 0x865   :  { %v1100_v12 = vadd.f32 %v2671_v37, %v1099_v13 }
 0x866   :  { %v1109_v43 = vmax.f32 %v1105_v36, 0.0 }
 0x867   :  { %v1108_v42 = vmax.f32 %v1100_v12, 0.0 }
 0x869   :  { %2937 = vmatprep.mubr.f32.mxu1 %v1108_v42 }
 0x86a   :  { %2938 = vmatmul.mubr.f32.vlgmr.msra.gmra.mrb[8].mxu1 %v1109_v43 }
 0x86b   :  { %2983 = vmatprep.mubr.msk.f32.mxu1 %vm3288_vm3, %v3287_v14 }
 0x93d   :  { %v2939_v45 = vpop.f32.mrb[8].mxu1 }
 0x93e   :  { %v1203_v46 = vadd.f32 %v2939_v45, %v2674_v44  ;;  %v1197_v47 = vpop.f32.mrb[9].mxu1 }
 0x93f   :  { %v1198_v48 = vadd.f32 %v2674_v44, %v1197_v47 }
 0x940   :  { %v1207_v49 = vadd.f32 %v1203_v46, %v1017_v35 }
 0x941   :  { %v1206_v50 = vadd.f32 %v1198_v48, %v1016_v33 }
 0x942   :  { %v1213_v51 = vsel %vm128_vm2, %v1207_v49, 0.0  ;;  %v1217_v52 = vmul.f32 %v1207_v49, %v1207_v49 }
 0x943   :  { %1214 = vadd.xlane.f32.xlu0 %v1213_v51  ;;  %v1210_v53 = vsel %vm128_vm2, %v1206_v50, 0.0  ;;  %v1216_v54 = vmul.f32 %v1206_v50, %v1206_v50 }
 0x944   :  { %1211 = vadd.xlane.f32.xlu1 %v1210_v53  ;;  %v1221_v55 = vsel %vm128_vm2, %v1217_v52, 0.0 }
 0x945   :  { %v1218_v56 = vsel %vm128_vm2, %v1216_v54, 0.0 }
 0x947   :  { %1222 = vadd.xlane.f32.xlu0 %v1221_v55 }
 0x948   :  { %1219 = vadd.xlane.f32.xlu1 %v1218_v56 }
 0x9d0   :  { %v1215_v63 = vpop.xlane.xlu0 %1214 }
 0x9d1   :  { %v1225_v0 = vmul.f32 0.03125, %v1215_v63  ;;  %v1212_v1 = vpop.xlane.xlu1 %1211 }
 0x9d2   :  { %v1224_v2 = vmul.f32 0.03125, %v1212_v1 }
 0x9d3   :  { %v1229_v4 = vmul.f32 %v1225_v0, %v1225_v0  ;;  %v1235_v18 = vsub.f32 %v1207_v49, %v1225_v0 }
 0x9d4   :  { %v1223_v3 = vpop.xlane.xlu0 %1222  ;;  %v1228_v7 = vmul.f32 %v1224_v2, %v1224_v2  ;;  %v1234_v20 = vsub.f32 %v1206_v50, %v1224_v2 }
 0x9d5   :  { %v1227_v5 = vmul.f32 0.03125, %v1223_v3  ;;  %v1220_v6 = vpop.xlane.xlu1 %1219 }
 0x9d6   :  { %v1226_v8 = vmul.f32 0.03125, %v1220_v6 }
 0x9d7   :  { %v1231_v9 = vsub.f32 %v1227_v5, %v1229_v4 }
 0x9d8   :  { %v1230_v10 = vsub.f32 %v1226_v8, %v1228_v7 }
 0x9d9   :  { %v1233_v11 = vmax.f32 %v1231_v9, 0.0 }
 0x9da   :  { %v1232_v15 = vmax.f32 %v1230_v10, 0.0 }
 0x9db   :  { %v1237_v16 = vadd.f32 1e-05, %v1233_v11 }
 0x9dc   :  { %v1236_v17 = vadd.f32 1e-05, %v1232_v15 }
 0x9dd   :  { %3224 = vrsqrt.f32 %v1237_v16 }
 0x9de   :  { %3226 = vrsqrt.f32 %v1236_v17 }
 0x9e7   :  { %v3225_v19 = vpop.eup %3224 }
 0x9e8   :  { %v3227_v22 = vpop.eup %3226  ;;  %v1241_v23 = vmul.f32 %v3225_v19, %v1235_v18 }
 0x9e9   :  { %v1240_v24 = vmul.f32 %v3227_v22, %v1234_v20 }
 0x9ea   :  { %v1247_v26 = vmul.f32 %v2675_v21, %v1241_v23 }
 0x9eb   :  { %v1246_v27 = vmul.f32 %v2675_v21, %v1240_v24 }
 0x9ec   :  { %v3436_v29 = vadd.f32 %v2676_v25, %v1247_v26  ;;  %v2012_v26 = vld [vmem:[#allocation2 + $0x158] sm:$0xff] }
 0x9ed   :  { %v3434_v28 = vadd.f32 %v2676_v25, %v1246_v27  ;;  %v2013_v27 = vld [vmem:[#allocation2 + $0x160] sm:$0xff] }
 0x9ef   :  { %2948 = vmatprep.mubr.msk.f32.mxu0 %vm128_vm2, %v3434_v28 }
 0x9f0   :  { %2949 = vmatmul.mubr.msk.f32.vlgmr.msra.gmra.mrb[16].mxu0 %vm128_vm2, %v3436_v29 }
 0x9f1   :  { %2953 = vmatprep.mubr.msk.f32.mxu0 %vm3288_vm3, %v3287_v14 }
 0xac3   :  { %v2950_v31 = vpop.f32.mrb[16].mxu0 }
 0xac4   :  { %v3444_v32 = vadd.f32 %v2950_v31, %v2677_v30  ;;  %v1335_v33 = vpop.f32.mrb[17].mxu0 }
 0xac5   :  { %v1336_v34 = vadd.f32 %v2677_v30, %v1335_v33  ;;  %v3134_v30 = vpack.c.bf16 %v2013_v27, %v2012_v26  ;;  %v2014_v33 = vld [vmem:[#allocation2 + $0x168] sm:$0xff] }
 0xac6   :  { %1348 = vrot.lane.b32.xlu0 %v3444_v32, %s3290_s1 }
 0xac7   :  { %1346 = vrot.lane.b32.xlu1 %v1336_v34, %s3290_s1 }
 0xacb   :  { %1350 = vrot.lane.b32.xlu1 %v1336_v34, %s3289_s0 }
 0xacf   :  { %1426 = vrot.lane.b32.xlu1 %v3444_v32, %s3289_s0 }
 0xb38   :  { %v3452_v35 = vpop.permute.xlu0 %1348 }
 0xb39   :  { %1578 = vrot.lane.b32.xlu1 %v3452_v35, %s3289_s0  ;;  %v3456_v38 = vpop.permute.xlu1 %1346 }
 0xb3a   :  { %1502 = vrot.lane.b32.xlu0 %v3456_v38, %s3289_s0 }
 0xb3d   :  { %v1351_v39 = vpop.permute.xlu1 %1350 }
 0xb3e   :  { %2952 = vmatpush3.xpose.msk.msra.mxu0 %vm218_vm4, %v1351_v39 }
 0xb3f   :  { %2956 = vmatprep.subr.mxu0 %v3287_v14 }
 0xb41   :  { %2954 = vmatmul.mubr.msk.f32.vlgmr.msra.gmra.mrb[18].mxu0 %vm218_vm4, %v1336_v34  ;;  %v1427_v40 = vpop.permute.xlu1 %1426 }
 0xb42   :  { %2957 = vmatpush3.xpose.msk.msra.mxu0 %vm218_vm4, %v1427_v40  ;;  %2958 = vmatprep.mubr.msk.f32.mxu0 %vm3288_vm3, %v3287_v14 }
 0xb43   :  { %2961 = vmatprep.subr.mxu0 %v3287_v14 }
 0xb45   :  { %2959 = vmatmul.mubr.msk.f32.vlgmr.msra.gmra.mrb[20].mxu0 %vm218_vm4, %v3444_v32 }
 0xb46   :  { %2963 = vmatprep.mubr.msk.f32.mxu0 %vm3288_vm3, %v3287_v14 }
 0xbab   :  { %v1579_v41 = vpop.permute.xlu1 %1578 }
 0xbac   :  { %v1503_v37 = vpop.permute.xlu0 %1502 }
 0xbad   :  { %2962 = vmatpush3.xpose.msk.msra.mxu0 %vm218_vm4, %v1503_v37 }
 0xbae   :  { %2966 = vmatprep.subr.mxu0 %v3287_v14 }
 0xbb0   :  { %2964 = vmatmul.mubr.msk.f32.vlgmr.msra.gmra.mrb[22].mxu0 %vm218_vm4, %v3456_v38 }
 0xbb1   :  { %2967 = vmatpush3.xpose.msk.msra.mxu0 %vm218_vm4, %v1579_v41  ;;  %2968 = vmatprep.mubr.msk.f32.mxu0 %vm3288_vm3, %v3287_v14 }
 0xbb2   :  { %2971 = vmatprep.subr.mxu0 %v3287_v14 }
 0xbb4   :  { %2969 = vmatmul.mubr.msk.f32.vlgmr.msra.gmra.mrb[24].mxu0 %vm218_vm4, %v3452_v35 }
 0xbb5   :  { %2973 = vmatprep.mubr.msk.f32.mxu0 %vm3288_vm3, %v3287_v14 }
 0xc14   :  { %v1422_v36 = vpop.f32.mrb[18].mxu0 }
 0xc15   :  { %v2955_v13 = vpop.f32.mrb[19].mxu0  ;;  %v1654_v12 = vsel %vm521_vm5, %v1422_v36, -inf }
 0xc16   :  { %1655 = vmax.xlane.f32.xlu0 %v1654_v12 }
 0xc18   :  { %v1498_v42 = vpop.f32.mrb[20].mxu0 }
 0xc19   :  { %v2960_v43 = vpop.f32.mrb[21].mxu0  ;;  %v1657_v44 = vsel %vm521_vm5, %v1498_v42, -inf }
 0xc1a   :  { %1658 = vmax.xlane.f32.xlu1 %v1657_v44  ;;  %v2692_v44 = vld [vmem:[#allocation2 + $0x178] ss:$0 sm:$0xff] }
 0xc2b   :  { %1698 = vrot.lane.b32.xlu1 %v1336_v34, %s3291_s27  ;;  %v2015_v34 = vld [vmem:[#allocation2 + $0x170] sm:$0xff] }
 0xc83   :  { %v1574_v45 = vpop.f32.mrb[22].mxu0 }
 0xc84   :  { %v2965_v46 = vpop.f32.mrb[23].mxu0  ;;  %v1660_v47 = vsel %vm521_vm5, %v1574_v45, -inf }
 0xc85   :  { %1661 = vmax.xlane.f32.xlu0 %v1660_v47 }
 0xc87   :  { %v1650_v48 = vpop.f32.mrb[24].mxu0 }
 0xc88   :  { %v2970_v49 = vpop.f32.mrb[25].mxu0  ;;  %v1663_v50 = vsel %vm521_vm5, %v1650_v48, -inf }
 0xc89   :  { %1664 = vmax.xlane.f32.xlu0 %v1663_v50 }
 0xca3   :  { %v1656_v51 = vpop.xlane.xlu0 %1655 }
 0xca4   :  { %v1666_v52 = vsub.f32 %v1422_v36, %v1656_v51 }
 0xca6   :  { %v1670_v53 = vmul.f32 1.442695, %v1666_v52 }
 0xca7   :  { %v1659_v54 = vpop.xlane.xlu1 %1658 }
 0xca8   :  { %3228 = vpow2.f32 %v1670_v53  ;;  %v1667_v55 = vsub.f32 %v1498_v42, %v1659_v54 }
 0xcaa   :  { %v1672_v56 = vmul.f32 1.442695, %v1667_v55  ;;  %v2150_v55 = vld [vmem:[#allocation2 + $0x190] sm:$0xff] }
 0xcab   :  { %v1699_v57 = vpop.permute.xlu1 %1698 }
 0xcac   :  { %3230 = vpow2.f32 %v1672_v56  ;;  %2972 = vmatpush3.msra.mxu0 %v1699_v57  ;;  %v2151_v56 = vld [vmem:[#allocation2 + $0x198] sm:$0xff]  ;;  %v2152_v57 = vld [vmem:[#allocation2 + $0x1a0] sm:$0xff] }
 0xcad   :  { %2976 = vmatprep.subr.mxu0 %v3287_v14 }
 0xcb2   :  { %v3229_v58 = vpop.eup %3228 }
 0xcb3   :  { %v1678_v59 = vsel %vm521_vm5, %v3229_v58, 0.0 }
 0xcb4   :  { %1679 = vadd.xlane.f32.xlu1 %v1678_v59  ;;  %v2153_v59 = vld [vmem:[#allocation2 + $0x1a8] sm:$0xff] }
 0xcb6   :  { %v3231_v60 = vpop.eup %3230 }
 0xcb7   :  { %v1681_v61 = vsel %vm521_vm5, %v3231_v60, 0.0 }
 0xcb8   :  { %1682 = vadd.xlane.f32.xlu0 %v1681_v61  ;;  %v2242_v61 = vld [vmem:[#allocation2 + $0x1b8] sm:$0xff] }
 0xd12   :  { %v1662_v62 = vpop.xlane.xlu0 %1661 }
 0xd13   :  { %v1668_v63 = vsub.f32 %v1574_v45, %v1662_v62  ;;  %v2243_v62 = vld [vmem:[#allocation2 + $0x1c0] sm:$0xff] }
 0xd15   :  { %v1674_v0 = vmul.f32 1.442695, %v1668_v63  ;;  %v2244_v63 = vld [vmem:[#allocation2 + $0x1c8] sm:$0xff] }
 0xd16   :  { %v1665_v1 = vpop.xlane.xlu0 %1664 }
 0xd17   :  { %3232 = vpow2.f32 %v1674_v0  ;;  %v1669_v2 = vsub.f32 %v1650_v48, %v1665_v1  ;;  %v3150_v0 = vpack.c.bf16 %v2243_v62, %v2242_v61  ;;  %v2245_v1 = vld [vmem:[#allocation2 + $0x1d0] sm:$0xff] }
 0xd19   :  { %v1676_v3 = vmul.f32 1.442695, %v1669_v2  ;;  %v3154_v2 = vpack.c.bf16 %v2245_v1, %v2244_v63 }
 0xd1b   :  { %3234 = vpow2.f32 %v1676_v3  ;;  %v2246_v3 = vld [vmem:[#allocation2 + $0x1d8] sm:$0xff] }
 0xd21   :  { %v3233_v4 = vpop.eup %3232 }
 0xd22   :  { %v1684_v5 = vsel %vm521_vm5, %v3233_v4, 0.0 }
 0xd23   :  { %1685 = vadd.xlane.f32.xlu1 %v1684_v5 }
 0xd25   :  { %v3235_v6 = vpop.eup %3234 }
 0xd26   :  { %v1687_v7 = vsel %vm521_vm5, %v3235_v6, 0.0 }
 0xd27   :  { %1688 = vadd.xlane.f32.xlu0 %v1687_v7  ;;  %v2249_v7 = vld [vmem:[#allocation2 + $0x1f0] sm:$0xff] }
 0xd34   :  { %1850 = vrot.lane.b32.xlu1 %v3456_v38, %s3291_s27 }
 0xd38   :  { %1926 = vrot.lane.b32.xlu1 %v3452_v35, %s3291_s27  ;;  %v3138_v35 = vpack.c.bf16 %v2015_v34, %v2014_v33 }
 0xd3d   :  { %1774 = vrot.lane.b32.xlu0 %v3444_v32, %s3291_s27 }
 0xd41   :  { %v1680_v8 = vpop.xlane.xlu1 %1679 }
 0xd42   :  { %3236 = vrcp.f32 %v1680_v8 }
 0xd45   :  { %v1683_v11 = vpop.xlane.xlu0 %1682 }
 0xd46   :  { %3238 = vrcp.f32 %v1683_v11 }
 0xd4c   :  { %v3237_v9 = vpop.eup %3236 }
 0xd4d   :  { %v1694_v10 = vmul.f32 %v3237_v9, %v3229_v58  ;;  %v3142_v58 = vpack.c.bf16 %v2151_v56, %v2150_v55  ;;  %v2250_v9 = vld [vmem:[#allocation2 + $0x1f8] sm:$0xff] }
 0xd4f   :  { %2974 = vmatmul.mubr.msk.f32.vlgmr.msra.gmra.mrb[26].mxu0 %vm521_vm5, %v1694_v10  ;;  %v2251_v10 = vld [vmem:[#allocation2 + $0x200] sm:$0xff] }
 0xd50   :  { %2978 = vmatprep.mubr.msk.f32.mxu0 %vm3288_vm3, %v3287_v14  ;;  %v3239_v18 = vpop.eup %3238  ;;  %v3166_v11 = vpack.c.bf16 %v2251_v10, %v2250_v9  ;;  %v3293_v9 = vmov 0.0|0.0  }
 0xd51   :  { %v1695_v19 = vmul.f32 %v3239_v18, %v3231_v60  ;;  %v3146_v60 = vpack.c.bf16 %v2153_v59, %v2152_v57  ;;  %v2254_v18 = vld [vmem:[#allocation2 + $0x218] sm:$0xff] }
 0xd52   :  { %v2700_v57 = vld [vmem:[#allocation2 + $0x238] ss:$0 sm:$0xff] }
 0xdb0   :  { %v1686_v15 = vpop.xlane.xlu1 %1685 }
 0xdb1   :  { %3240 = vrcp.f32 %v1686_v15  ;;  %v2252_v15 = vld [vmem:[#allocation2 + $0x208] sm:$0xff] }
 0xdb4   :  { %v1689_v16 = vpop.xlane.xlu0 %1688  ;;  %v1851_v17 = vpop.permute.xlu1 %1850 }
 0xdb5   :  { %3242 = vrcp.f32 %v1689_v16  ;;  %2982 = vmatpush3.msra.mxu1 %v1851_v17  ;;  %v2253_v16 = vld [vmem:[#allocation2 + $0x210] sm:$0xff] }
 0xdb6   :  { %3135 = vmatprep.subr.bf16.mxu1 %v3134_v30  ;;  %v3170_v17 = vpack.c.bf16 %v2253_v16, %v2252_v15 }
 0xdb8   :  { %v1775_v20 = vpop.permute.xlu0 %1774  ;;  %v1927_v21 = vpop.permute.xlu1 %1926 }
 0xdb9   :  { %2977 = vmatpush3.msra.mxu0 %v1775_v20 }
 0xdba   :  { %2979 = vmatmul.mubr.msk.f32.vlgmr.msra.gmra.mrb[28].mxu0 %vm521_vm5, %v1695_v19  ;;  %2986 = vmatprep.subr.mxu0 %v3287_v14  ;;  %v2255_v19 = vld [vmem:[#allocation2 + $0x220] sm:$0xff] }
 0xdbb   :  { %v3241_v22 = vpop.eup %3240  ;;  %2987 = vmatpush3.msra.mxu0 %v1927_v21  ;;  %2988 = vmatprep.mubr.msk.f32.mxu0 %vm3288_vm3, %v3287_v14  ;;  %v3174_v20 = vpack.c.bf16 %v2255_v19, %v2254_v18 }
 0xdbc   :  { %v1696_v23 = vmul.f32 %v3241_v22, %v3233_v4  ;;  %3143 = vmatprep.subr.bf16.mxu0 %v3142_v58  ;;  %v2247_v4 = vld [vmem:[#allocation2 + $0x1e0] sm:$0xff] }
 0xdbd   :  { %v3158_v5 = vpack.c.bf16 %v2247_v4, %v2246_v3 }
 0xdbe   :  { %2984 = vmatmul.mubr.msk.f32.vlgmr.msra.gmra.mrb[10].mxu1 %vm521_vm5, %v1696_v23 }
 0xdbf   :  { %v3243_v24 = vpop.eup %3242  ;;  %3137 = vmatpush3.bf16.msra.mxu1 %v3134_v30 }
 0xdc0   :  { %v1697_v25 = vmul.f32 %v3243_v24, %v3235_v6  ;;  %3139 = vmatprep.subr.bf16.mxu1 %v3138_v35  ;;  %v2248_v6 = vld [vmem:[#allocation2 + $0x1e8] sm:$0xff] }
 0xdc1   :  { %v3162_v8 = vpack.c.bf16 %v2249_v7, %v2248_v6  ;;  %v2403_v6 = vld [vmem:[#allocation2 + $0x250] sm:$0xff]  ;;  %v2404_v7 = vld [vmem:[#allocation2 + $0x258] sm:$0xff] }
 0xdc2   :  { %2989 = vmatmul.mubr.msk.f32.vlgmr.msra.gmra.mrb[30].mxu0 %vm521_vm5, %v1697_v25  ;;  %v3183_v10 = vpack.c.bf16 %v2404_v7, %v2403_v6  ;;  %v2524_v6 = vld [vmem:[#allocation2 + $0x2a0] sm:$0xff] }
 0xdc3   :  { %3141 = vmatpush3.bf16.msra.mxu1 %v3138_v35  ;;  %3145 = vmatpush3.bf16.msra.mxu0 %v3142_v58 }
 0xdc4   :  { %3147 = vmatprep.subr.bf16.mxu0 %v3146_v60  ;;  %3151 = vmatprep.subr.bf16.mxu1 %v3150_v0 }
 0xdc7   :  { %3149 = vmatpush3.bf16.msra.mxu0 %v3146_v60 }
 0xdc8   :  { %3182 = vmatprep.subr.bf16.mxu0 %v3293_v9 }
 0xe22   :  { %v1770_v31 = vpop.f32.mrb[26].mxu0 }
 0xe23   :  { %v2975_v32 = vpop.f32.mrb[27].mxu0 }
 0xe8d   :  { %v1846_v38 = vpop.f32.mrb[28].mxu0 }
 0xe8e   :  { %v2980_v39 = vpop.f32.mrb[29].mxu0 }
 0xe91   :  { %v1922_v40 = vpop.f32.mrb[10].mxu1 }
 0xe92   :  { %2004 = vrot.lane.b32.xlu0 %v1922_v40, %s3292_s28  ;;  %v2985_v37 = vpop.f32.mrb[11].mxu1 }
 0xe95   :  { %v1998_v41 = vpop.f32.mrb[30].mxu0 }
 0xe96   :  { %2006 = vrot.lane.b32.xlu1 %v1998_v41, %s3292_s28  ;;  %v2990_v36 = vpop.f32.mrb[31].mxu0 }
 0xe97   :  { %v2695_v36 = vld [vmem:[#allocation2 + $0x180] ss:$0 sm:$0xff] }
 0xf04   :  { %v2005_v13 = vpop.permute.xlu0 %2004 }
 0xf05   :  { %v2010_v12 = vsel %vm218_vm4, %v1770_v31, %v2005_v13 }
 0xf06   :  { %2999 = vmatprep.mubr.msk.f32.mxu1 %vm128_vm2, %v2010_v12  ;;  %v2696_v12 = vld [vmem:[#allocation2 + $0x188] ss:$0 sm:$0xff] }
 0xf08   :  { %v2007_v42 = vpop.permute.xlu1 %2006 }
 0xf09   :  { %v2011_v43 = vsel %vm218_vm4, %v1846_v38, %v2007_v42 }
 0xf0a   :  { %3000 = vmatmul.mubr.msk.f32.vlgmr.msra.gmra.mrb[12].mxu1 %vm128_vm2, %v2011_v43 }
 0xf0b   :  { %3153 = vmatpush3.bf16.msra.mxu1 %v3150_v0 }
 0xf0c   :  { %3155 = vmatprep.subr.bf16.mxu1 %v3154_v2 }
 0xf0f   :  { %3157 = vmatpush3.bf16.msra.mxu1 %v3154_v2 }
 0xf10   :  { %3159 = vmatprep.subr.bf16.mxu1 %v3158_v5 }
 0xf13   :  { %3161 = vmatpush3.bf16.msra.mxu1 %v3158_v5 }
 0xf14   :  { %3163 = vmatprep.subr.bf16.mxu1 %v3162_v8 }
 0xf17   :  { %3165 = vmatpush3.bf16.msra.mxu1 %v3162_v8  ;;  %v2405_v8 = vld [vmem:[#allocation2 + $0x260] sm:$0xff] }
 0xf18   :  { %3167 = vmatprep.subr.bf16.mxu1 %v3166_v11 }
 0xf1b   :  { %3169 = vmatpush3.bf16.msra.mxu1 %v3166_v11  ;;  %v2406_v11 = vld [vmem:[#allocation2 + $0x268] sm:$0xff] }
 0xf1c   :  { %3171 = vmatprep.subr.bf16.mxu1 %v3170_v17  ;;  %v3186_v15 = vpack.c.bf16 %v2406_v11, %v2405_v8 }
 0xf1f   :  { %3173 = vmatpush3.bf16.msra.mxu1 %v3170_v17 }
 0xf20   :  { %3175 = vmatprep.subr.bf16.mxu1 %v3174_v20 }
 0xf23   :  { %3177 = vmatpush3.bf16.msra.mxu1 %v3174_v20 }
 0xfdd   :  { %v3001_v45 = vpop.f32.mrb[12].mxu1 }
 0xfde   :  { %v2099_v46 = vadd.f32 %v3001_v45, %v2692_v44  ;;  %v2093_v47 = vpop.f32.mrb[13].mxu1 }
 0xfdf   :  { %v2094_v48 = vadd.f32 %v2692_v44, %v2093_v47 }
 0xfe0   :  { %v3515_v49 = vadd.f32 %v2099_v46, %v3436_v29 }
 0xfe1   :  { %v3518_v50 = vadd.f32 %v2094_v48, %v3434_v28 }
 0xfe2   :  { %v2109_v51 = vsel %vm128_vm2, %v3515_v49, 0.0  ;;  %v2113_v29 = vmul.f32 %v3515_v49, %v3515_v49 }
 0xfe3   :  { %2110 = vadd.xlane.f32.xlu1 %v2109_v51  ;;  %v2106_v52 = vsel %vm128_vm2, %v3518_v50, 0.0  ;;  %v2112_v53 = vmul.f32 %v3518_v50, %v3518_v50  ;;  %v2257_v51 = vld [vmem:[#allocation2 + $0x230] sm:$0xff] }
 0xfe4   :  { %2107 = vadd.xlane.f32.xlu0 %v2106_v52  ;;  %v2117_v28 = vsel %vm128_vm2, %v2113_v29, 0.0 }
 0xfe5   :  { %v2114_v54 = vsel %vm128_vm2, %v2112_v53, 0.0  ;;  %v2697_v53 = vld [vmem:[#allocation2 + $0x1b0] ss:$0 sm:$0xff] }
 0xfe8   :  { %2115 = vadd.xlane.f32.xlu0 %v2114_v54 }
 0xfec   :  { %2118 = vadd.xlane.f32.xlu0 %v2117_v28 }
0x1070   :  { %v2111_v23 = vpop.xlane.xlu1 %2110 }
0x1071   :  { %v2108_v21 = vpop.xlane.xlu0 %2107  ;;  %v2121_v25 = vmul.f32 0.03125, %v2111_v23 }
0x1072   :  { %v2120_v22 = vmul.f32 0.03125, %v2108_v21 }
0x1073   :  { %v2125_v32 = vmul.f32 %v2121_v25, %v2121_v25  ;;  %v2131_v42 = vsub.f32 %v3515_v49, %v2121_v25 }
0x1074   :  { %v2124_v26 = vmul.f32 %v2120_v22, %v2120_v22  ;;  %v2130_v37 = vsub.f32 %v3518_v50, %v2120_v22  ;;  %v2256_v50 = vld [vmem:[#allocation2 + $0x228] sm:$0xff] }
0x1075   :  { %v2116_v24 = vpop.xlane.xlu0 %2115  ;;  %v3178_v52 = vpack.c.bf16 %v2257_v51, %v2256_v50 }
0x1076   :  { %v2122_v27 = vmul.f32 0.03125, %v2116_v24 }
0x1077   :  { %3179 = vmatprep.subr.bf16.mxu1 %v3178_v52 }
0x1078   :  { %v2126_v30 = vsub.f32 %v2122_v27, %v2124_v26  ;;  %3181 = vmatpush3.bf16.msra.mxu1 %v3178_v52 }
0x1079   :  { %v2119_v31 = vpop.xlane.xlu0 %2118 }
0x107a   :  { %v2128_v33 = vmax.f32 %v2126_v30, 0.0  ;;  %v2123_v34 = vmul.f32 0.03125, %v2119_v31 }
0x107c   :  { %v2132_v35 = vadd.f32 1e-05, %v2128_v33  ;;  %v2127_v38 = vsub.f32 %v2123_v34, %v2125_v32 }
0x107e   :  { %3244 = vrsqrt.f32 %v2132_v35  ;;  %v2129_v39 = vmax.f32 %v2127_v38, 0.0 }
0x1080   :  { %v2133_v40 = vadd.f32 1e-05, %v2129_v39  ;;  %v2701_v39 = vld [vmem:[#allocation2 + $0x240] ss:$0 sm:$0xff] }
0x1082   :  { %3246 = vrsqrt.f32 %v2133_v40 }
0x1088   :  { %v3245_v41 = vpop.eup %3244 }
0x1089   :  { %v2136_v13 = vmul.f32 %v3245_v41, %v2130_v37 }
0x108b   :  { %v2142_v43 = vmul.f32 %v2695_v36, %v2136_v13 }
0x108c   :  { %v3247_v44 = vpop.eup %3246 }
0x108d   :  { %v2137_v45 = vmul.f32 %v3247_v44, %v2131_v42  ;;  %v2148_v46 = vadd.f32 %v2696_v12, %v2142_v43 }
0x108f   :  { %v2143_v47 = vmul.f32 %v2695_v36, %v2137_v45  ;;  %3010 = vmatprep.mubr.msk.f32.mxu0 %vm128_vm2, %v2148_v46  ;;  %v2702_v36 = vld [vmem:[#allocation2 + $0x248] ss:$0 sm:$0xff] }
0x1091   :  { %v2149_v48 = vadd.f32 %v2696_v12, %v2143_v47 }
0x1093   :  { %3011 = vmatmul.mubr.msk.f32.vlgmr.msra.gmra.mrb[32].mxu0 %vm128_vm2, %v2149_v48 }
0x1094   :  { %3056 = vmatprep.mubr.msk.f32.mxu0 %vm3288_vm3, %v3287_v14  ;;  %3184 = vmatpush3.bf16.msra.mxu0 %v3183_v10 }
0x1095   :  { %3185 = vmatprep.subr.bf16.mxu0 %v3293_v9 }
0x1098   :  { %3187 = vmatpush3.bf16.msra.mxu0 %v3186_v15 }
0x1099   :  { %3188 = vmatprep.subr.bf16.mxu0 %v3293_v9 }
0x1166   :  { %v3012_v49 = vpop.f32.mrb[32].mxu0 }
0x1167   :  { %v2237_v54 = vadd.f32 %v3012_v49, %v2697_v53  ;;  %v2231_v29 = vpop.f32.mrb[33].mxu0 }
0x1168   :  { %v2232_v28 = vadd.f32 %v2697_v53, %v2231_v29 }
0x1169   :  { %v2241_v56 = vmax.f32 %v2237_v54, 0.0 }
0x116a   :  { %v2240_v55 = vmax.f32 %v2232_v28, 0.0 }
0x116c   :  { %3045 = vmatprep.mubr.f32.mxu1 %v2240_v55 }
0x116d   :  { %3046 = vmatmul.mubr.f32.vlgmr.msra.gmra.mrb[14].mxu1 %v2241_v56 }
0x1240   :  { %v3047_v58 = vpop.f32.mrb[14].mxu1 }
0x1241   :  { %v2335_v59 = vadd.f32 %v3047_v58, %v2700_v57  ;;  %v2329_v60 = vpop.f32.mrb[15].mxu1 }
0x1242   :  { %v2330_v61 = vadd.f32 %v2700_v57, %v2329_v60 }
0x1243   :  { %v2339_v62 = vadd.f32 %v2335_v59, %v2149_v48  ;;  %v2703_v59 = vld [vmem:[#allocation2 + $0x270] ss:$0 sm:$0xff] }
0x1244   :  { %v2338_v63 = vadd.f32 %v2330_v61, %v2148_v46 }
0x1245   :  { %v2345_v0 = vsel %vm128_vm2, %v2339_v62, 0.0  ;;  %v2349_v1 = vmul.f32 %v2339_v62, %v2339_v62 }
0x1246   :  { %2346 = vadd.xlane.f32.xlu0 %v2345_v0  ;;  %v2342_v2 = vsel %vm128_vm2, %v2338_v63, 0.0  ;;  %v2348_v3 = vmul.f32 %v2338_v63, %v2338_v63 }
0x1247   :  { %2343 = vadd.xlane.f32.xlu1 %v2342_v2  ;;  %v2353_v4 = vsel %vm128_vm2, %v2349_v1, 0.0  ;;  %v2521_v2 = vld [vmem:[#allocation2 + $0x288] sm:$0xff] }
0x1248   :  { %v2350_v5 = vsel %vm128_vm2, %v2348_v3, 0.0  ;;  %v2522_v3 = vld [vmem:[#allocation2 + $0x290] sm:$0xff] }
0x124a   :  { %2354 = vadd.xlane.f32.xlu0 %v2353_v4  ;;  %v3189_v4 = vpack.c.bf16 %v2522_v3, %v2521_v2 }
0x124b   :  { %2351 = vadd.xlane.f32.xlu1 %v2350_v5  ;;  %v2523_v5 = vld [vmem:[#allocation2 + $0x298] sm:$0xff] }
0x12d3   :  { %v2347_v16 = vpop.xlane.xlu0 %2346 }
0x12d4   :  { %v2357_v17 = vmul.f32 0.03125, %v2347_v16  ;;  %v2344_v18 = vpop.xlane.xlu1 %2343 }
0x12d5   :  { %v2356_v19 = vmul.f32 0.03125, %v2344_v18 }
0x12d6   :  { %v2361_v21 = vmul.f32 %v2357_v17, %v2357_v17  ;;  %v2367_v34 = vsub.f32 %v2339_v62, %v2357_v17 }
0x12d7   :  { %v2355_v20 = vpop.xlane.xlu0 %2354  ;;  %v2360_v24 = vmul.f32 %v2356_v19, %v2356_v19  ;;  %v2366_v38 = vsub.f32 %v2338_v63, %v2356_v19 }
0x12d8   :  { %v2359_v22 = vmul.f32 0.03125, %v2355_v20  ;;  %v2352_v23 = vpop.xlane.xlu1 %2351 }
0x12d9   :  { %v2358_v25 = vmul.f32 0.03125, %v2352_v23  ;;  %v2706_v23 = vld [vmem:[#allocation2 + $0x280] ss:$0 sm:$0xff] }
0x12da   :  { %v2363_v26 = vsub.f32 %v2359_v22, %v2361_v21  ;;  %v2705_v21 = vld [vmem:[#allocation2 + $0x278] ss:$0 sm:$0xff] }
0x12db   :  { %v2362_v27 = vsub.f32 %v2358_v25, %v2360_v24 }
0x12dc   :  { %v2365_v30 = vmax.f32 %v2363_v26, 0.0 }
0x12dd   :  { %v2364_v31 = vmax.f32 %v2362_v27, 0.0  ;;  %v2708_v27 = vld [vmem:[#allocation2 + $0x2a8] ss:$0 sm:$0xff] }
0x12de   :  { %v2369_v32 = vadd.f32 1e-05, %v2365_v30 }
0x12df   :  { %v2368_v33 = vadd.f32 1e-05, %v2364_v31 }
0x12e0   :  { %3248 = vrsqrt.f32 %v2369_v32 }
0x12e1   :  { %3250 = vrsqrt.f32 %v2368_v33 }
0x12ea   :  { %v3249_v35 = vpop.eup %3248 }
0x12eb   :  { %v3251_v40 = vpop.eup %3250  ;;  %v2373_v37 = vmul.f32 %v3249_v35, %v2367_v34 }
0x12ec   :  { %v2372_v41 = vmul.f32 %v3251_v40, %v2366_v38 }
0x12ed   :  { %v2379_v13 = vmul.f32 %v2701_v39, %v2373_v37 }
0x12ee   :  { %v2378_v12 = vmul.f32 %v2701_v39, %v2372_v41 }
0x12ef   :  { %v2385_v42 = vadd.f32 %v2702_v36, %v2379_v13 }
0x12f0   :  { %v2384_v43 = vadd.f32 %v2702_v36, %v2378_v12 }
0x12f1   :  { %v2393_v44 = vsel %vm128_vm2, %v2385_v42, 0.0 }
0x12f2   :  { %v2386_v45 = vsel %vm128_vm2, %v2384_v43, 0.0  ;;  %v2394_v46 = vrot.slane %v2393_v44, 4 }
0x12f3   :  { %v2387_v47 = vrot.slane %v2386_v45, 4 }
0x12f4   :  { %v2395_v48 = vadd.f32 %v2394_v46, %v2393_v44 }
0x12f5   :  { %v2388_v50 = vadd.f32 %v2387_v47, %v2386_v45 }
0x12f6   :  { %v2396_v51 = vrot.slane %v2395_v48, 2 }
0x12f7   :  { %v2389_v52 = vrot.slane %v2388_v50, 2 }
0x12f8   :  { %v2397_v53 = vadd.f32 %v2396_v51, %v2395_v48 }
0x12f9   :  { %v2390_v49 = vadd.f32 %v2389_v52, %v2388_v50 }
0x12fa   :  { %v2398_v54 = vrot.slane %v2397_v53, 1 }
0x12fb   :  { %v2391_v29 = vrot.slane %v2390_v49, 1 }
0x12fc   :  { %v2399_v28 = vadd.f32 %v2398_v54, %v2397_v53  ;;  %v2709_v54 = vld [vmem:[#allocation2 + $0x2b0] ss:$0 sm:$0xff] }
0x12fd   :  { %v2392_v55 = vadd.f32 %v2391_v29, %v2390_v49 }
0x12fe   :  { %v2402_v56 = vmul.f32 0.125, %v2399_v28 }
0x12ff   :  { %v2401_v57 = vmul.f32 0.125, %v2392_v55 }
0x1301   :  { %v2415_v58 = vsel %vm2414_vm6, %v2402_v56, %v2401_v57 }
0x1302   :  { %3057 = vmatmul.mubr.msk.f32.vlgmr.msra.gmra.mrb[34].mxu0 %vm128_vm2, %v2415_v58 }
0x1303   :  { %3067 = vmatprep.mubr.msk.f32.mxu0 %vm3288_vm3, %v3287_v14  ;;  %3190 = vmatpush3.bf16.msra.mxu0 %v3189_v4  ;;  %v3192_v14 = vpack.c.bf16 %v2524_v6, %v2523_v5 }
0x1304   :  { %3191 = vmatprep.subr.bf16.mxu0 %v3293_v9 }
0x1307   :  { %3193 = vmatpush3.bf16.msra.mxu0 %v3192_v14 }
0x13d5   :  { %v2484_v60 = vpop.f32.mrb[34].mxu0 }
0x13d6   :  { %v2485_v61 = vadd.f32 %v2703_v59, %v2484_v60  ;;  %v3058_v62 = vpop.f32.mrb[35].mxu0 }
0x13d8   :  { %v2491_v63 = vsel %vm2490_vm7, %v2485_v61, 0.0  ;;  %v2494_v0 = vmul.f32 %v2485_v61, %v2485_v61 }
0x13d9   :  { %2492 = vadd.xlane.f32.xlu1 %v2491_v63 }
0x13da   :  { %v2495_v1 = vsel %vm2490_vm7, %v2494_v0, 0.0 }
0x13db   :  { %2496 = vadd.xlane.f32.xlu0 %v2495_v1 }
0x1466   :  { %v2493_v7 = vpop.xlane.xlu1 %2492 }
0x1467   :  { %v2498_v8 = vmul.f32 0.03125, %v2493_v7 }
0x1468   :  { %v2497_v10 = vpop.xlane.xlu0 %2496 }
0x1469   :  { %v2500_v11 = vmul.f32 %v2498_v8, %v2498_v8  ;;  %v2499_v15 = vmul.f32 0.03125, %v2497_v10  ;;  %v2503_v19 = vsub.f32 %v2485_v61, %v2498_v8 }
0x146b   :  { %v2501_v16 = vsub.f32 %v2499_v15, %v2500_v11 }
0x146d   :  { %v2502_v17 = vmax.f32 %v2501_v16, 0.0 }
0x146f   :  { %v2504_v18 = vadd.f32 1e-05, %v2502_v17 }
0x1471   :  { %3252 = vrsqrt.f32 %v2504_v18 }
0x147b   :  { %v3253_v20 = vpop.eup %3252 }
0x147c   :  { %v2506_v22 = vmul.f32 %v3253_v20, %v2503_v19 }
0x147e   :  { %v2511_v24 = vmul.f32 %v2705_v21, %v2506_v22 }
0x1480   :  { %v2516_v25 = vadd.f32 %v2706_v23, %v2511_v24 }
0x1482   :  { %3068 = vmatmul.mubr.msk.f32.vlgmr.msra.gmra.mrb[36].mxu0 %vm128_vm2, %v2516_v25  ;;  %v2517_v9 = vmul.f32 %v2516_v25, %v2516_v25 }
0x1484   :  { %v2518_v26 = vsel %vm2490_vm7, %v2517_v9, 0.0 }
0x1485   :  { %2519 = vadd.xlane.f32.xlu1 %v2518_v26 }
0x1512   :  { %v2520_v30 = vpop.xlane.xlu1 %2519 }
0x1513   :  { %v2603_v32 = vadd.f32 %v2708_v27, %v2520_v30 }
0x1555   :  { %v2594_v31 = vpop.f32.mrb[36].mxu0 }
0x1556   :  { %v2604_v33 = vmul.f32 2.0, %v2594_v31  ;;  %v3069_v34 = vpop.f32.mrb[37].mxu0 }
0x1558   :  { %v2605_v35 = vsub.f32 %v2603_v32, %v2604_v33 }
0x155a   :  { %v2606_v38 = vmax.f32 %v2605_v35, 0.0 }
0x155c   :  { %3254 = vrsqrt.f32 %v2606_v38  ;;  %v2624_v37 = vmul.f32 -0.5, %v2606_v38  ;;  %vm2609_vm8 = vcmp.eq.f32.partialorder %v2606_v38, inf  ;;  %v2612_v41 = vand.u32 2147483648, %v2606_v38 }
0x155d   :  { %vm2611_vm9 = vcmp.eq.f32.partialorder %v2606_v38, 0.0 }
0x155e   :  { %v2625_v42 = vmul.f32 1.2345679, %v2624_v37 }
0x1560   :  { %v2626_v45 = vmul.f32 1.442695, %v2625_v42 }
0x1566   :  { %v3255_v39 = vpop.eup %3254 }
0x1567   :  { %v2608_v40 = vmul.f32 %v3255_v39, %v2606_v38 }
0x1569   :  { %v2610_v36 = vsel %vm2609_vm8, %v2606_v38, %v2608_v40 }
0x156a   :  { %v2613_v13 = vsel %vm2611_vm9, %v2612_v41, %v2610_v36 }
0x156b   :  { %v2614_v12 = vmul.f32 0.7692308, %v2613_v13 }
0x156d   :  { %v2620_v43 = vmul.f32 -2.236068, %v2614_v12  ;;  %v2615_v46 = vmul.f32 2.236068, %v2614_v12  ;;  %v2617_v47 = vmul.f32 1.6666666, %v2614_v12 }
0x156f   :  { %v2621_v44 = vmul.f32 1.442695, %v2620_v43  ;;  %v2616_v48 = vadd.f32 1.0, %v2615_v46  ;;  %v2618_v50 = vmul.f32 %v2617_v47, %v2614_v12 }
0x1571   :  { %3256 = vpow2.f32 %v2621_v44  ;;  %v2619_v51 = vadd.f32 %v2618_v50, %v2616_v48 }
0x1572   :  { %3258 = vpow2.f32 %v2626_v45 }
0x157b   :  { %v3257_v52 = vpop.eup %3256 }
0x157c   :  { %v2623_v53 = vmul.f32 %v3257_v52, %v2619_v51  ;;  %v3259_v49 = vpop.eup %3258 }
0x157e   :  { %v2628_v29 = vadd.f32 %v3259_v49, %v2623_v53 }
0x1580   :  { %v2634_v28 = vmul.f32 %v2709_v54, %v2628_v29 }
0x1582   :  { %v2636_v55 = vsel %vm2635_vm10, %v2634_v28, 0.0 }
0x1583   :  { %2637 = vadd.xlane.f32.xlu0 %v2636_v55 }
0x1610   :  { %v2638_v56 = vpop.xlane.xlu0 %2637 }
0x1611   :  { %v2639_v57 = vadd.f32 0.25, %v2638_v56 }
0x1613   :  { %2641 = vst.msk [vmem:[%s3558_s2] sm:$0x3] %vm2640_vm11, %v2639_v57 }
0x1614   :  { %2646 = vsyncpa [#allocation3], 1 }

</bundles_post_ra>
